<compile_context>
chip_gen: v7x
topology: tpu7x:2x2x1
jax: 0.10.0
libtpu: 0.0.40
codegen_flags: <defaults>
</compile_context>

<pallas_src>
import functools
import math

import jax
import jax.numpy as jnp
from jax.experimental import pallas as pl
from jax.experimental.pallas import tpu as pltpu


_VMEM_BUDGET = 20 * 1024 * 1024   # accounted per-kernel working set
_VMEM_LIMIT = 36 * 1024 * 1024    # scoped-VMEM cap: fits v5e/v6e (128 MiB) and v7x (64 MiB)

_COMPILER_PARAMS = pltpu.CompilerParams(
    dimension_semantics=("parallel", "parallel"),
    vmem_limit_bytes=_VMEM_LIMIT)


# ----------------------------------------------------------------------------
# Helpers
# ----------------------------------------------------------------------------
def _round_up(x, m):
    return (x + m - 1) // m * m


def _pad_last(x, n_pad):
    n = x.shape[-1]
    return x if n_pad == n else jnp.pad(x, ((0, 0), (0, 0), (0, n_pad - n)))


def _mxu_dtype(dtype):
    # bf16 operands on the MXU when the model runs in bf16; otherwise keep f32.
    return jnp.bfloat16 if jnp.dtype(dtype) == jnp.dtype(jnp.bfloat16) else jnp.float32


def _choose_tiles(batch, n, act_bytes_per_col, weight_bytes, f32_bytes_per_col):
    """Pick (bb, tn): lane tile tn (multiple of 128 dividing n) + batch block bb.

    Budget counts double-buffered activation blocks, double-buffered weights and
    in-kernel f32 temporaries (important for v7x's 64 MiB VMEM)."""
    def footprint(bb, tn):
        return (2 * bb * tn * act_bytes_per_col     # in/out blocks, double-buffered
                + 2 * weight_bytes                  # weight + bias blocks
                + tn * f32_bytes_per_col)           # f32 temporaries in the body
    tn = 128
    for cand in (2048, 1024, 512, 256, 128):
        if n % cand == 0 and footprint(1, cand) <= _VMEM_BUDGET:
            tn = cand
            break
    bb = 1
    if tn < 512:  # small-N case: block over batch to keep >=512 lanes per step
        for cand in range(min(batch, 8), 1, -1):
            if batch % cand == 0 and cand * tn <= 1024 and footprint(cand, tn) <= _VMEM_BUDGET:
                bb = cand
                break
    return bb, tn


def _act_spec(bb, c, tn):
    return pl.BlockSpec((bb, c, tn), lambda i, j: (i, 0, j))


def _w_spec(shape):
    return pl.BlockSpec(shape, lambda i, j: (0,) * len(shape))


# ----------------------------------------------------------------------------
# In-kernel math helpers
# ----------------------------------------------------------------------------
def _ln_stats(x32, eps):
    # Channel LayerNorm (biased variance, eps inside sqrt) -> normalized xhat.
    mean = jnp.mean(x32, axis=0, keepdims=True)
    diff = x32 - mean
    var = jnp.mean(diff * diff, axis=0, keepdims=True)
    return diff * jax.lax.rsqrt(var + eps)


def _erf_f32(x):
    # Abramowitz & Stegun 7.1.26 (|err| <= 1.5e-7) using exp/div/select only,
    # so it lowers in Mosaic regardless of erf-primitive support.
    ax = jnp.abs(x)
    t = 1.0 / (1.0 + 0.3275911 * ax)
    poly = ((((1.061405429 * t - 1.453152027) * t + 1.421413741) * t
             - 0.284496736) * t + 0.254829592) * t
    y = 1.0 - poly * jnp.exp(-(ax * ax))
    return jnp.where(x < 0.0, -y, y)


def _gelu_exact_f32(x):
    # Matches nn.GELU() (erf form) to ~1e-7.
    return 0.5 * x * (1.0 + _erf_f32(x * 0.7071067811865476))


# ----------------------------------------------------------------------------
# Kernels (all loop over a small static batch block `bb`)
# ----------------------------------------------------------------------------
def _ln_proj_kernel(x_ref, w_ref, b_ref, o_ref, *, eps, mxu_dtype):
    # o = W_fold @ LNhat(x) + b_fold   (LN affine pre-folded into W / bias)
    w = w_ref[...]
    bias = b_ref[...].astype(jnp.float32)
    for bi in range(x_ref.shape[0]):
        xhat = _ln_stats(x_ref[bi].astype(jnp.float32), eps)
        out = jnp.dot(w, xhat.astype(mxu_dtype), preferred_element_type=jnp.float32)
        o_ref[bi] = (out + bias).astype(o_ref.dtype)


def _ln_q_xhat_kernel(x_ref, w_ref, b_ref, q_ref, xhat_ref, *, eps, mxu_dtype):
    # GlobalAttention pre-norm: emit q = (Wq*g)@xhat + Wq@b AND xhat itself
    # (xhat feeds the strided to_kv conv outside -> removes the standalone LN).
    w = w_ref[...]
    bias = b_ref[...].astype(jnp.float32)
    for bi in range(x_ref.shape[0]):
        xhat = _ln_stats(x_ref[bi].astype(jnp.float32), eps)
        xhat_ref[bi] = xhat.astype(xhat_ref.dtype)
        q = jnp.dot(w, xhat.astype(mxu_dtype), preferred_element_type=jnp.float32)
        q_ref[bi] = (q + bias).astype(q_ref.dtype)


def _proj_res_kernel(y_ref, res_ref, w_ref, b_ref, o_ref, *, mxu_dtype):
    # o = W @ y + bias + residual   (residual add fused -> no extra HBM pass)
    w = w_ref[...]
    bias = b_ref[...].astype(jnp.float32)
    for bi in range(y_ref.shape[0]):
        out = jnp.dot(w, y_ref[bi].astype(mxu_dtype), preferred_element_type=jnp.float32)
        out = out + bias + res_ref[bi].astype(jnp.float32)
        o_ref[bi] = out.astype(o_ref.dtype)


def _ff_kernel(x_ref, w1_ref, b1_ref, w2_ref, b2_ref, o_ref, *, eps, mxu_dtype):
    # Whole FeedForward residual block: LN -> W1+b1 -> GELU -> W2+b2 -> +x.
    # The (hidden, tn) intermediate lives only in VMEM/vregs.
    w1 = w1_ref[...]
    w2 = w2_ref[...]
    b1 = b1_ref[...].astype(jnp.float32)
    b2 = b2_ref[...].astype(jnp.float32)
    for bi in range(x_ref.shape[0]):
        x32 = x_ref[bi].astype(jnp.float32)
        xhat = _ln_stats(x32, eps)
        h = jnp.dot(w1, xhat.astype(mxu_dtype), preferred_element_type=jnp.float32) + b1
        h = _gelu_exact_f32(h)
        out = jnp.dot(w2, h.astype(mxu_dtype), preferred_element_type=jnp.float32) + b2
        o_ref[bi] = (out + x32).astype(o_ref.dtype)


# ----------------------------------------------------------------------------
# Pallas wrappers (inputs already padded: N % 128 == 0)
# ----------------------------------------------------------------------------
def ln_conv1x1_pallas(x, g, b, w, bias=None, eps=1e-5):
    """Fused channel-LayerNorm + pointwise (1x1-conv) projection."""
    B, Cin, N = x.shape
    Cout = w.shape[0]
    assert N % 128 == 0
    mxu_dt = _mxu_dtype(x.dtype)
    gv = g.reshape(Cin).astype(jnp.float32)
    bv = b.reshape(Cin).astype(jnp.float32)
    w32 = w.astype(jnp.float32)
    w_fold = (w32 * gv[None, :]).astype(mxu_dt)
    bias_vec = jnp.zeros((Cout,), jnp.float32) if bias is None else bias.astype(jnp.float32)
    b_fold = (w32 @ bv + bias_vec).reshape(Cout, 1)

    itemsize = x.dtype.itemsize
    wbytes = Cout * Cin * jnp.dtype(mxu_dt).itemsize + Cout * 4
    bb, tn = _choose_tiles(B, N, (Cin + Cout) * itemsize, wbytes, (2 * Cin + Cout) * 4)
    cost = pl.CostEstimate(
        flops=B * N * (2 * Cout * Cin + 8 * Cin),
        transcendentals=B * N,
        bytes_accessed=B * N * (Cin + Cout) * itemsize + wbytes)
    return pl.pallas_call(
        functools.partial(_ln_proj_kernel, eps=eps, mxu_dtype=mxu_dt),
        out_shape=jax.ShapeDtypeStruct((B, Cout, N), x.dtype),
        grid_spec=pltpu.PrefetchScalarGridSpec(
            num_scalar_prefetch=0,
            grid=(B // bb, N // tn),
            in_specs=[_act_spec(bb, Cin, tn), _w_spec((Cout, Cin)), _w_spec((Cout, 1))],
            out_specs=_act_spec(bb, Cout, tn)),
        compiler_params=_COMPILER_PARAMS,
        cost_estimate=cost,
    )(x, w_fold, b_fold)


def ln_q_xhat_pallas(x, g, b, w_q, eps=1e-5):
    """GlobalAttention pre-norm: returns (q, xhat) from one kernel."""
    B, C, N = x.shape
    inner = w_q.shape[0]
    assert N % 128 == 0
    mxu_dt = _mxu_dtype(x.dtype)
    gv = g.reshape(C).astype(jnp.float32)
    bv = b.reshape(C).astype(jnp.float32)
    wq32 = w_q.astype(jnp.float32)
    w_fold = (wq32 * gv[None, :]).astype(mxu_dt)
    b_fold = (wq32 @ bv).reshape(inner, 1)                 # to_q has bias=False

    itemsize = x.dtype.itemsize
    wbytes = inner * C * jnp.dtype(mxu_dt).itemsize + inner * 4
    bb, tn = _choose_tiles(B, N, (2 * C + inner) * itemsize, wbytes, (2 * C + inner) * 4)
    cost = pl.CostEstimate(
        flops=B * N * (2 * inner * C + 8 * C),
        transcendentals=B * N,
        bytes_accessed=B * N * (2 * C + inner) * itemsize + wbytes)
    return pl.pallas_call(
        functools.partial(_ln_q_xhat_kernel, eps=eps, mxu_dtype=mxu_dt),
        out_shape=(jax.ShapeDtypeStruct((B, inner, N), x.dtype),
                   jax.ShapeDtypeStruct((B, C, N), x.dtype)),
        grid_spec=pltpu.PrefetchScalarGridSpec(
            num_scalar_prefetch=0,
            grid=(B // bb, N // tn),
            in_specs=[_act_spec(bb, C, tn), _w_spec((inner, C)), _w_spec((inner, 1))],
            out_specs=[_act_spec(bb, inner, tn), _act_spec(bb, C, tn)]),
        compiler_params=_COMPILER_PARAMS,
        cost_estimate=cost,
    )(x, w_fold, b_fold)


def conv1x1_res_pallas(y, res, w, bias=None):
    """out = W @ y + bias + res  (1x1 conv with the residual add fused)."""
    B, Cin, N = y.shape
    Cout = w.shape[0]
    assert N % 128 == 0 and res.shape == (B, Cout, N)
    mxu_dt = _mxu_dtype(y.dtype)
    w_c = w.astype(mxu_dt)
    bias_vec = jnp.zeros((Cout,), jnp.float32) if bias is None else bias.astype(jnp.float32)
    b_col = bias_vec.reshape(Cout, 1)

    itemsize = y.dtype.itemsize
    wbytes = Cout * Cin * jnp.dtype(mxu_dt).itemsize + Cout * 4
    bb, tn = _choose_tiles(B, N, (Cin + 2 * Cout) * itemsize, wbytes, (Cin + 2 * Cout) * 4)
    cost = pl.CostEstimate(
        flops=B * N * (2 * Cout * Cin + 2 * Cout),
        transcendentals=0,
        bytes_accessed=B * N * (Cin + 2 * Cout) * itemsize + wbytes)
    return pl.pallas_call(
        functools.partial(_proj_res_kernel, mxu_dtype=mxu_dt),
        out_shape=jax.ShapeDtypeStruct((B, Cout, N), res.dtype),
        grid_spec=pltpu.PrefetchScalarGridSpec(
            num_scalar_prefetch=0,
            grid=(B // bb, N // tn),
            in_specs=[_act_spec(bb, Cin, tn), _act_spec(bb, Cout, tn),
                      _w_spec((Cout, Cin)), _w_spec((Cout, 1))],
            out_specs=_act_spec(bb, Cout, tn)),
        compiler_params=_COMPILER_PARAMS,
        cost_estimate=cost,
    )(y, res, w_c, b_col)


def feed_forward_pallas(x, g, b, w1, b1, w2, b2, eps=1e-5):
    """Whole FeedForward residual block: W2 @ gelu(W1 @ LN(x) + b1) + b2 + x."""
    B, C, N = x.shape
    H = w1.shape[0]
    assert N % 128 == 0
    mxu_dt = _mxu_dtype(x.dtype)
    gv = g.reshape(C).astype(jnp.float32)
    bv = b.reshape(C).astype(jnp.float32)
    w1_32 = w1.astype(jnp.float32)
    w1_fold = (w1_32 * gv[None, :]).astype(mxu_dt)
    b1_fold = (w1_32 @ bv + b1.astype(jnp.float32)).reshape(H, 1)
    w2_c = w2.astype(mxu_dt)
    b2_col = b2.astype(jnp.float32).reshape(C, 1)

    itemsize = x.dtype.itemsize
    msize = jnp.dtype(mxu_dt).itemsize
    wbytes = 2 * H * C * msize + (H + C) * 4
    bb, tn = _choose_tiles(B, N, 2 * C * itemsize, wbytes, (3 * C + 2 * H) * 4)
    cost = pl.CostEstimate(
        flops=B * N * (4 * H * C + 8 * C + 10 * H),
        transcendentals=B * N * (H + 1),
        bytes_accessed=2 * B * N * C * itemsize + wbytes)
    return pl.pallas_call(
        functools.partial(_ff_kernel, eps=eps, mxu_dtype=mxu_dt),
        out_shape=jax.ShapeDtypeStruct((B, C, N), x.dtype),
        grid_spec=pltpu.PrefetchScalarGridSpec(
            num_scalar_prefetch=0,
            grid=(B // bb, N // tn),
            in_specs=[_act_spec(bb, C, tn), _w_spec((H, C)), _w_spec((H, 1)),
                      _w_spec((C, H)), _w_spec((C, 1))],
            out_specs=_act_spec(bb, C, tn)),
        compiler_params=_COMPILER_PARAMS,
        cost_estimate=cost,
    )(x, w1_fold, b1_fold, w2_c, b2_col)


# ----------------------------------------------------------------------------
# Pure-JAX reference primitives (use_pallas=False check path)
# ----------------------------------------------------------------------------
def _ref_layernorm(x, g, b, eps=1e-5):
    mean = jnp.mean(x, axis=1, keepdims=True)
    var = jnp.mean((x - mean) ** 2, axis=1, keepdims=True)    # unbiased=False
    return (x - mean) / jnp.sqrt(var + eps) * g + b


def _ref_conv1x1(x, w, bias=None):
    y = jnp.einsum('oc,bcl->bol', w, x)
    if bias is not None:
        y = y + bias[None, :, None]
    return y


# ----------------------------------------------------------------------------
# Transformer sub-blocks (residual add is inside the blocks)
# ----------------------------------------------------------------------------
def local_attention_block(cfg, prm, x, use_pallas):
    B, C, L = x.shape
    h, d, p = cfg['heads'], cfg['dim_head'], cfg['patch_size']
    inner = h * d
    l = L // p
    scale = d ** -0.5
    if use_pallas:
        qkv = ln_conv1x1_pallas(x, prm['ln_g'], prm['ln_b'], prm['w_qkv'], None)
    else:
        xn = _ref_layernorm(x, prm['ln_g'], prm['ln_b'])
        qkv = _ref_conv1x1(xn, prm['w_qkv'], None)
    q, k, v = jnp.split(qkv, 3, axis=1)

    def to_heads(t):                                          # -> (B, l, h, p, d)
        return t.reshape(B, h, d, l, p).transpose(0, 3, 1, 4, 2)

    q, k, v = map(to_heads, (q, k, v))
    dots = jnp.einsum('blhid,blhjd->blhij', q, k) * scale
    attn = jax.nn.softmax(dots, axis=-1)
    out = jnp.einsum('blhij,blhjd->blhid', attn, v)           # (B, l, h, p, d)
    out = out.transpose(0, 2, 4, 1, 3).reshape(B, inner, L)   # b (h d) (l p)
    if use_pallas:
        return conv1x1_res_pallas(out, x, prm['w_out'], prm['b_out'])
    return _ref_conv1x1(out, prm['w_out'], prm['b_out']) + x


def global_attention_block(cfg, prm, x, use_pallas, real_n):
    B, C, L = x.shape
    h, d, kk = cfg['heads'], cfg['dim_head'], cfg['global_k']
    inner = h * d
    Lk = real_n // kk
    scale = d ** -0.5
    if use_pallas:
        q, xhat = ln_q_xhat_pallas(x, prm['ln_g'], prm['ln_b'], prm['w_q'])
        # strided to_kv conv (kernel=k, stride=k, no bias) with LN affine folded:
        #   kv = (W_kv*g) (*) xhat + W_kv @ b    (only real columns feed the kv)
        gv = prm['ln_g'].reshape(C).astype(jnp.float32)
        bv = prm['ln_b'].reshape(C).astype(jnp.float32)
        w_kv = prm['w_kv'].astype(jnp.float32)
        xr = xhat[:, :, :Lk * kk].astype(jnp.float32).reshape(B, C, Lk, kk)
        kv = jnp.einsum('oct,bcjt->boj', w_kv * gv[None, :, None], xr)
        kv = (kv + jnp.einsum('oct,c->o', w_kv, bv)[None, :, None]).astype(x.dtype)
    else:
        xn = _ref_layernorm(x, prm['ln_g'], prm['ln_b'])
        q = _ref_conv1x1(xn, prm['w_q'], None)
        xr = xn[:, :, :Lk * kk].reshape(B, C, Lk, kk)
        kv = jnp.einsum('oct,bcjt->boj', prm['w_kv'], xr)
    k_, v_ = jnp.split(kv, 2, axis=1)

    def to_heads(t, length):                                  # -> (B, h, len, d)
        return t.reshape(B, h, d, length).transpose(0, 1, 3, 2)

    qh, kh, vh = to_heads(q, L), to_heads(k_, Lk), to_heads(v_, Lk)
    dots = jnp.einsum('bhid,bhjd->bhij', qh, kh) * scale
    attn = jax.nn.softmax(dots, axis=-1)
    out = jnp.einsum('bhij,bhjd->bhid', attn, vh)             # (B, h, L, d)
    out = out.transpose(0, 1, 3, 2).reshape(B, inner, L)      # b (h d) l
    if use_pallas:
        return conv1x1_res_pallas(out, x, prm['w_out'], prm['b_out'])
    return _ref_conv1x1(out, prm['w_out'], prm['b_out']) + x


def feed_forward_block(cfg, prm, x, use_pallas):
    if use_pallas:
        return feed_forward_pallas(x, prm['ln_g'], prm['ln_b'],
                                   prm['w1'], prm['b1'], prm['w2'], prm['b2'])
    xn = _ref_layernorm(x, prm['ln_g'], prm['ln_b'])
    hdn = jax.nn.gelu(_ref_conv1x1(xn, prm['w1'], prm['b1']), approximate=False)
    return _ref_conv1x1(hdn, prm['w2'], prm['b2']) + x


def transformer_forward(cfg, params, x, use_pallas=True):
    B, C, N = x.shape
    if use_pallas:
        # Pad the sequence axis ONCE (lane-dense + local-patch aligned).  Padded
        # columns only ever see column-local ops / padded-only attention patches
        # (p | N) and are excluded from the global kv, so they never leak into
        # the real columns; sliced off once at the end.
        n_pad = _round_up(N, math.lcm(128, cfg['patch_size']))
        xw = _pad_last(x, n_pad)
    else:
        xw = x
    for layer in params['layers']:
        xw = local_attention_block(cfg, layer['local'], xw, use_pallas)
        xw = feed_forward_block(cfg, layer['ff1'], xw, use_pallas)
        xw = global_attention_block(cfg, layer['glob'], xw, use_pallas, real_n=N)
        xw = feed_forward_block(cfg, layer['ff2'], xw, use_pallas)
    return xw[:, :, :N] if xw.shape[-1] != N else xw


# ----------------------------------------------------------------------------
# Parameter init (deterministic)
# ----------------------------------------------------------------------------
def _normal(key, shape, std=0.1):
    return std * jax.random.normal(key, shape, dtype=jnp.float32)


def init_params(key, cfg):
    dim = cfg['dim']
    inner = cfg['heads'] * cfg['dim_head']
    hidden = dim * cfg['mlp_mult']
    kk = cfg['global_k']

    def ln(k):   # non-trivial affine so the LN-fold path is actually exercised
        kg, kb = jax.random.split(k)
        return (1.0 + 0.1 * jax.random.normal(kg, (1, dim, 1), jnp.float32),
                0.1 * jax.random.normal(kb, (1, dim, 1), jnp.float32))

    layers = []
    for _ in range(cfg['depth']):
        key, *ks = jax.random.split(key, 21)
        g1, b1 = ln(ks[0]); g2, b2 = ln(ks[1]); g3, b3 = ln(ks[2]); g4, b4 = ln(ks[3])
        layers.append(dict(
            local=dict(ln_g=g1, ln_b=b1,
                       w_qkv=_normal(ks[4], (3 * inner, dim)),
                       w_out=_normal(ks[5], (dim, inner)),
                       b_out=_normal(ks[6], (dim,))),
            ff1=dict(ln_g=g2, ln_b=b2,
                     w1=_normal(ks[7], (hidden, dim)), b1=_normal(ks[8], (hidden,)),
                     w2=_normal(ks[9], (dim, hidden)), b2=_normal(ks[10], (dim,))),
            glob=dict(ln_g=g3, ln_b=b3,
                      w_q=_normal(ks[11], (inner, dim)),
                      w_kv=_normal(ks[12], (2 * inner, dim, kk)),
                      w_out=_normal(ks[13], (dim, inner)),
                      b_out=_normal(ks[14], (dim,))),
            ff2=dict(ln_g=g4, ln_b=b4,
                     w1=_normal(ks[15], (hidden, dim)), b1=_normal(ks[16], (hidden,)),
                     w2=_normal(ks[17], (dim, hidden)), b2=_normal(ks[18], (dim,))),
        ))
    return {'layers': layers}


# ----------------------------------------------------------------------------
if __name__ == "__main__":
    key = jax.random.PRNGKey(0)
    B, dim, L = 2, 8, 16                        # (batch, channels, sequence)
    cfg = dict(dim=dim, depth=2, heads=2, dim_head=4, mlp_mult=2,
               patch_size=4, global_k=4)        # L % patch_size == 0, L % global_k == 0
    k_param, k_x = jax.random.split(key)
    params = init_params(k_param, cfg)
    x = jax.random.normal(k_x, (B, dim, L), dtype=jnp.float32)

    fwd_pallas = jax.jit(lambda p, xx: transformer_forward(cfg, p, xx, use_pallas=True))
    fwd_ref = jax.jit(lambda p, xx: transformer_forward(cfg, p, xx, use_pallas=False))

    out = jax.block_until_ready(fwd_pallas(params, x))
    ref = jax.block_until_ready(fwd_ref(params, x))

    assert out.shape == x.shape and out.dtype == x.dtype
    max_err = float(jnp.max(jnp.abs(out - ref)))
    assert jnp.allclose(out, ref, atol=1e-4, rtol=1e-4), f"max abs err {max_err}"

    print("KERNEL_OK")
</pallas_src>

<mosaic_0001>
module attributes {stable_mosaic.version = 11 : i64} {
  func.func @_ln_proj_kernel(%arg0: i32, %arg1: i32, %arg2: memref<2x8x128xf32, #tpu.memory_space<vmem>>, %arg3: memref<24x8xf32, #tpu.memory_space<vmem>>, %arg4: memref<24x1xf32, #tpu.memory_space<vmem>>, %arg5: memref<2x24x128xf32, #tpu.memory_space<vmem>>) attributes {dimension_semantics = [#tpu.dimension_semantics<parallel>, #tpu.dimension_semantics<parallel>], iteration_bounds = array<i64: 1, 1>, scalar_prefetch = 0 : i64, scratch_operands = 0 : i64, tpu.core_type = #tpu.core_type<tc>, window_params = [{transform_indices = @transform_0, window_bounds = array<i64: 2, 8, 128>}, {pipeline_mode = #tpu.pipeline_mode<synchronous>, transform_indices = @transform_1, window_bounds = array<i64: 24, 8>}, {pipeline_mode = #tpu.pipeline_mode<synchronous>, transform_indices = @transform_2, window_bounds = array<i64: 24, 1>}, {transform_indices = @transform_3, window_bounds = array<i64: 2, 24, 128>}]} {
    %c0 = arith.constant 0 : index
    %c0_0 = arith.constant 0 : index
    %0 = vector.load %arg3[%c0, %c0_0] : memref<24x8xf32, #tpu.memory_space<vmem>>, vector<24x8xf32>
    %c0_1 = arith.constant 0 : index
    %c0_2 = arith.constant 0 : index
    %1 = vector.load %arg4[%c0_1, %c0_2] : memref<24x1xf32, #tpu.memory_space<vmem>>, vector<24x1xf32>
    %c0_3 = arith.constant 0 : index
    %c0_4 = arith.constant 0 : index
    %c0_5 = arith.constant 0 : index
    %2 = vector.load %arg2[%c0_3, %c0_4, %c0_5] : memref<2x8x128xf32, #tpu.memory_space<vmem>>, vector<1x8x128xf32>
    %3 = vector.shape_cast %2 : vector<1x8x128xf32> to vector<8x128xf32>
    %cst = arith.constant dense<0.000000e+00> : vector<128xf32>
    %4 = vector.multi_reduction <add>, %3, %cst [0] : vector<8x128xf32> to vector<128xf32>
    %5 = vector.shape_cast %4 : vector<128xf32> to vector<1x128xf32>
    %cst_6 = arith.constant 8.000000e+00 : f32
    %6 = vector.broadcast %cst_6 : f32 to vector<1x128xf32>
    %7 = arith.divf %5, %6 : vector<1x128xf32>
    %8 = vector.broadcast %7 : vector<1x128xf32> to vector<8x128xf32>
    %9 = arith.subf %3, %8 : vector<8x128xf32>
    %10 = arith.mulf %9, %9 : vector<8x128xf32>
    %cst_7 = arith.constant dense<0.000000e+00> : vector<128xf32>
    %11 = vector.multi_reduction <add>, %10, %cst_7 [0] : vector<8x128xf32> to vector<128xf32>
    %12 = vector.shape_cast %11 : vector<128xf32> to vector<1x128xf32>
    %cst_8 = arith.constant 8.000000e+00 : f32
    %13 = vector.broadcast %cst_8 : f32 to vector<1x128xf32>
    %14 = arith.divf %12, %13 : vector<1x128xf32>
    %cst_9 = arith.constant 9.99999974E-6 : f32
    %15 = vector.broadcast %cst_9 : f32 to vector<1x128xf32>
    %16 = arith.addf %14, %15 : vector<1x128xf32>
    %17 = math.rsqrt %16 : vector<1x128xf32>
    %18 = vector.broadcast %17 : vector<1x128xf32> to vector<8x128xf32>
    %19 = arith.mulf %9, %18 : vector<8x128xf32>
    %cst_10 = arith.constant dense<0.000000e+00> : vector<24x128xf32>
    %20 = tpu.matmul %0, %19, %cst_10 {dimension_numbers = #tpu.dot_dimension_numbers<[1], [0], [0], [1], [0, 0, 1, 1], [], []>} : vector<24x8xf32>, vector<8x128xf32>, vector<24x128xf32> -> vector<24x128xf32>
    %21 = vector.broadcast %1 : vector<24x1xf32> to vector<24x128xf32>
    %22 = arith.addf %20, %21 : vector<24x128xf32>
    %c0_11 = arith.constant 0 : index
    %c0_12 = arith.constant 0 : index
    %c0_13 = arith.constant 0 : index
    %23 = vector.load %arg5[%c0_11, %c0_12, %c0_13] : memref<2x24x128xf32, #tpu.memory_space<vmem>>, vector<1x24x128xf32>
    %24 = vector.shape_cast %23 : vector<1x24x128xf32> to vector<24x128xf32>
    %25 = vector.shape_cast %22 : vector<24x128xf32> to vector<1x24x128xf32>
    tpu.vector_store %arg5[%c0_11, %c0_12, %c0_13], %25 {strides = array<i32>} : memref<2x24x128xf32, #tpu.memory_space<vmem>>, vector<1x24x128xf32>,
    %c1 = arith.constant 1 : index
    %c0_14 = arith.constant 0 : index
    %c0_15 = arith.constant 0 : index
    %26 = vector.load %arg2[%c1, %c0_14, %c0_15] : memref<2x8x128xf32, #tpu.memory_space<vmem>>, vector<1x8x128xf32>
    %27 = vector.shape_cast %26 : vector<1x8x128xf32> to vector<8x128xf32>
    %cst_16 = arith.constant dense<0.000000e+00> : vector<128xf32>
    %28 = vector.multi_reduction <add>, %27, %cst_16 [0] : vector<8x128xf32> to vector<128xf32>
    %29 = vector.shape_cast %28 : vector<128xf32> to vector<1x128xf32>
    %cst_17 = arith.constant 8.000000e+00 : f32
    %30 = vector.broadcast %cst_17 : f32 to vector<1x128xf32>
    %31 = arith.divf %29, %30 : vector<1x128xf32>
    %32 = vector.broadcast %31 : vector<1x128xf32> to vector<8x128xf32>
    %33 = arith.subf %27, %32 : vector<8x128xf32>
    %34 = arith.mulf %33, %33 : vector<8x128xf32>
    %cst_18 = arith.constant dense<0.000000e+00> : vector<128xf32>
    %35 = vector.multi_reduction <add>, %34, %cst_18 [0] : vector<8x128xf32> to vector<128xf32>
    %36 = vector.shape_cast %35 : vector<128xf32> to vector<1x128xf32>
    %cst_19 = arith.constant 8.000000e+00 : f32
    %37 = vector.broadcast %cst_19 : f32 to vector<1x128xf32>
    %38 = arith.divf %36, %37 : vector<1x128xf32>
    %cst_20 = arith.constant 9.99999974E-6 : f32
    %39 = vector.broadcast %cst_20 : f32 to vector<1x128xf32>
    %40 = arith.addf %38, %39 : vector<1x128xf32>
    %41 = math.rsqrt %40 : vector<1x128xf32>
    %42 = vector.broadcast %41 : vector<1x128xf32> to vector<8x128xf32>
    %43 = arith.mulf %33, %42 : vector<8x128xf32>
    %cst_21 = arith.constant dense<0.000000e+00> : vector<24x128xf32>
    %44 = tpu.matmul %0, %43, %cst_21 {dimension_numbers = #tpu.dot_dimension_numbers<[1], [0], [0], [1], [0, 0, 1, 1], [], []>} : vector<24x8xf32>, vector<8x128xf32>, vector<24x128xf32> -> vector<24x128xf32>
    %45 = vector.broadcast %1 : vector<24x1xf32> to vector<24x128xf32>
    %46 = arith.addf %44, %45 : vector<24x128xf32>
    %c1_22 = arith.constant 1 : index
    %c0_23 = arith.constant 0 : index
    %c0_24 = arith.constant 0 : index
    %47 = vector.load %arg5[%c1_22, %c0_23, %c0_24] : memref<2x24x128xf32, #tpu.memory_space<vmem>>, vector<1x24x128xf32>
    %48 = vector.shape_cast %47 : vector<1x24x128xf32> to vector<24x128xf32>
    %49 = vector.shape_cast %46 : vector<24x128xf32> to vector<1x24x128xf32>
    tpu.vector_store %arg5[%c1_22, %c0_23, %c0_24], %49 {strides = array<i32>} : memref<2x24x128xf32, #tpu.memory_space<vmem>>, vector<1x24x128xf32>,
    return
  }
  func.func @transform_0(%arg0: i32, %arg1: i32) -> (i32, i32, i32) {
    %c0_i32 = arith.constant 0 : i32
    %c0_i32_0 = arith.constant 0 : i32
    return %arg0, %c0_i32, %arg1 : i32, i32, i32
  }
  func.func @transform_1(%arg0: i32, %arg1: i32) -> (i32, i32) {
    %c0_i32 = arith.constant 0 : i32
    %c0_i32_0 = arith.constant 0 : i32
    %c0_i32_1 = arith.constant 0 : i32
    return %c0_i32, %c0_i32_0 : i32, i32
  }
  func.func @transform_2(%arg0: i32, %arg1: i32) -> (i32, i32) {
    %c0_i32 = arith.constant 0 : i32
    %c0_i32_0 = arith.constant 0 : i32
    %c0_i32_1 = arith.constant 0 : i32
    return %c0_i32, %c0_i32_0 : i32, i32
  }
  func.func @transform_3(%arg0: i32, %arg1: i32) -> (i32, i32, i32) {
    %c0_i32 = arith.constant 0 : i32
    %c0_i32_0 = arith.constant 0 : i32
    return %arg0, %c0_i32, %arg1 : i32, i32, i32
  }
}

module attributes {stable_mosaic.version = 11 : i64} {
  func.func @_proj_res_kernel(%arg0: i32, %arg1: i32, %arg2: memref<2x8x128xf32, #tpu.memory_space<vmem>>, %arg3: memref<2x8x128xf32, #tpu.memory_space<vmem>>, %arg4: memref<8x8xf32, #tpu.memory_space<vmem>>, %arg5: memref<8x1xf32, #tpu.memory_space<vmem>>, %arg6: memref<2x8x128xf32, #tpu.memory_space<vmem>>) attributes {dimension_semantics = [#tpu.dimension_semantics<parallel>, #tpu.dimension_semantics<parallel>], iteration_bounds = array<i64: 1, 1>, scalar_prefetch = 0 : i64, scratch_operands = 0 : i64, tpu.core_type = #tpu.core_type<tc>, window_params = [{transform_indices = @transform_0, window_bounds = array<i64: 2, 8, 128>}, {transform_indices = @transform_1, window_bounds = array<i64: 2, 8, 128>}, {pipeline_mode = #tpu.pipeline_mode<synchronous>, transform_indices = @transform_2, window_bounds = array<i64: 8, 8>}, {pipeline_mode = #tpu.pipeline_mode<synchronous>, transform_indices = @transform_3, window_bounds = array<i64: 8, 1>}, {transform_indices = @transform_4, window_bounds = array<i64: 2, 8, 128>}]} {
    %c0 = arith.constant 0 : index
    %c0_0 = arith.constant 0 : index
    %0 = vector.load %arg4[%c0, %c0_0] : memref<8x8xf32, #tpu.memory_space<vmem>>, vector<8x8xf32>
    %c0_1 = arith.constant 0 : index
    %c0_2 = arith.constant 0 : index
    %1 = vector.load %arg5[%c0_1, %c0_2] : memref<8x1xf32, #tpu.memory_space<vmem>>, vector<8x1xf32>
    %c0_3 = arith.constant 0 : index
    %c0_4 = arith.constant 0 : index
    %c0_5 = arith.constant 0 : index
    %2 = vector.load %arg2[%c0_3, %c0_4, %c0_5] : memref<2x8x128xf32, #tpu.memory_space<vmem>>, vector<1x8x128xf32>
    %3 = vector.shape_cast %2 : vector<1x8x128xf32> to vector<8x128xf32>
    %cst = arith.constant dense<0.000000e+00> : vector<8x128xf32>
    %4 = tpu.matmul %0, %3, %cst {dimension_numbers = #tpu.dot_dimension_numbers<[1], [0], [0], [1], [0, 0, 1, 1], [], []>} : vector<8x8xf32>, vector<8x128xf32>, vector<8x128xf32> -> vector<8x128xf32>
    %5 = vector.broadcast %1 : vector<8x1xf32> to vector<8x128xf32>
    %6 = arith.addf %4, %5 : vector<8x128xf32>
    %c0_6 = arith.constant 0 : index
    %c0_7 = arith.constant 0 : index
    %c0_8 = arith.constant 0 : index
    %7 = vector.load %arg3[%c0_6, %c0_7, %c0_8] : memref<2x8x128xf32, #tpu.memory_space<vmem>>, vector<1x8x128xf32>
    %8 = vector.shape_cast %7 : vector<1x8x128xf32> to vector<8x128xf32>
    %9 = arith.addf %6, %8 : vector<8x128xf32>
    %c0_9 = arith.constant 0 : index
    %c0_10 = arith.constant 0 : index
    %c0_11 = arith.constant 0 : index
    %10 = vector.load %arg6[%c0_9, %c0_10, %c0_11] : memref<2x8x128xf32, #tpu.memory_space<vmem>>, vector<1x8x128xf32>
    %11 = vector.shape_cast %10 : vector<1x8x128xf32> to vector<8x128xf32>
    %12 = vector.shape_cast %9 : vector<8x128xf32> to vector<1x8x128xf32>
    tpu.vector_store %arg6[%c0_9, %c0_10, %c0_11], %12 {strides = array<i32>} : memref<2x8x128xf32, #tpu.memory_space<vmem>>, vector<1x8x128xf32>,
    %c1 = arith.constant 1 : index
    %c0_12 = arith.constant 0 : index
    %c0_13 = arith.constant 0 : index
    %13 = vector.load %arg2[%c1, %c0_12, %c0_13] : memref<2x8x128xf32, #tpu.memory_space<vmem>>, vector<1x8x128xf32>
    %14 = vector.shape_cast %13 : vector<1x8x128xf32> to vector<8x128xf32>
    %cst_14 = arith.constant dense<0.000000e+00> : vector<8x128xf32>
    %15 = tpu.matmul %0, %14, %cst_14 {dimension_numbers = #tpu.dot_dimension_numbers<[1], [0], [0], [1], [0, 0, 1, 1], [], []>} : vector<8x8xf32>, vector<8x128xf32>, vector<8x128xf32> -> vector<8x128xf32>
    %16 = vector.broadcast %1 : vector<8x1xf32> to vector<8x128xf32>
    %17 = arith.addf %15, %16 : vector<8x128xf32>
    %c1_15 = arith.constant 1 : index
    %c0_16 = arith.constant 0 : index
    %c0_17 = arith.constant 0 : index
    %18 = vector.load %arg3[%c1_15, %c0_16, %c0_17] : memref<2x8x128xf32, #tpu.memory_space<vmem>>, vector<1x8x128xf32>
    %19 = vector.shape_cast %18 : vector<1x8x128xf32> to vector<8x128xf32>
    %20 = arith.addf %17, %19 : vector<8x128xf32>
    %c1_18 = arith.constant 1 : index
    %c0_19 = arith.constant 0 : index
    %c0_20 = arith.constant 0 : index
    %21 = vector.load %arg6[%c1_18, %c0_19, %c0_20] : memref<2x8x128xf32, #tpu.memory_space<vmem>>, vector<1x8x128xf32>
    %22 = vector.shape_cast %21 : vector<1x8x128xf32> to vector<8x128xf32>
    %23 = vector.shape_cast %20 : vector<8x128xf32> to vector<1x8x128xf32>
    tpu.vector_store %arg6[%c1_18, %c0_19, %c0_20], %23 {strides = array<i32>} : memref<2x8x128xf32, #tpu.memory_space<vmem>>, vector<1x8x128xf32>,
    return
  }
  func.func @transform_0(%arg0: i32, %arg1: i32) -> (i32, i32, i32) {
    %c0_i32 = arith.constant 0 : i32
    %c0_i32_0 = arith.constant 0 : i32
    return %arg0, %c0_i32, %arg1 : i32, i32, i32
  }
  func.func @transform_1(%arg0: i32, %arg1: i32) -> (i32, i32, i32) {
    %c0_i32 = arith.constant 0 : i32
    %c0_i32_0 = arith.constant 0 : i32
    return %arg0, %c0_i32, %arg1 : i32, i32, i32
  }
  func.func @transform_2(%arg0: i32, %arg1: i32) -> (i32, i32) {
    %c0_i32 = arith.constant 0 : i32
    %c0_i32_0 = arith.constant 0 : i32
    %c0_i32_1 = arith.constant 0 : i32
    return %c0_i32, %c0_i32_0 : i32, i32
  }
  func.func @transform_3(%arg0: i32, %arg1: i32) -> (i32, i32) {
    %c0_i32 = arith.constant 0 : i32
    %c0_i32_0 = arith.constant 0 : i32
    %c0_i32_1 = arith.constant 0 : i32
    return %c0_i32, %c0_i32_0 : i32, i32
  }
  func.func @transform_4(%arg0: i32, %arg1: i32) -> (i32, i32, i32) {
    %c0_i32 = arith.constant 0 : i32
    %c0_i32_0 = arith.constant 0 : i32
    return %arg0, %c0_i32, %arg1 : i32, i32, i32
  }
}

module attributes {stable_mosaic.version = 11 : i64} {
  func.func @_ff_kernel(%arg0: i32, %arg1: i32, %arg2: memref<2x8x128xf32, #tpu.memory_space<vmem>>, %arg3: memref<16x8xf32, #tpu.memory_space<vmem>>, %arg4: memref<16x1xf32, #tpu.memory_space<vmem>>, %arg5: memref<8x16xf32, #tpu.memory_space<vmem>>, %arg6: memref<8x1xf32, #tpu.memory_space<vmem>>, %arg7: memref<2x8x128xf32, #tpu.memory_space<vmem>>) attributes {dimension_semantics = [#tpu.dimension_semantics<parallel>, #tpu.dimension_semantics<parallel>], iteration_bounds = array<i64: 1, 1>, scalar_prefetch = 0 : i64, scratch_operands = 0 : i64, tpu.core_type = #tpu.core_type<tc>, window_params = [{transform_indices = @transform_0, window_bounds = array<i64: 2, 8, 128>}, {pipeline_mode = #tpu.pipeline_mode<synchronous>, transform_indices = @transform_1, window_bounds = array<i64: 16, 8>}, {pipeline_mode = #tpu.pipeline_mode<synchronous>, transform_indices = @transform_2, window_bounds = array<i64: 16, 1>}, {pipeline_mode = #tpu.pipeline_mode<synchronous>, transform_indices = @transform_3, window_bounds = array<i64: 8, 16>}, {pipeline_mode = #tpu.pipeline_mode<synchronous>, transform_indices = @transform_4, window_bounds = array<i64: 8, 1>}, {transform_indices = @transform_5, window_bounds = array<i64: 2, 8, 128>}]} {
    %c0 = arith.constant 0 : index
    %c0_0 = arith.constant 0 : index
    %0 = vector.load %arg3[%c0, %c0_0] : memref<16x8xf32, #tpu.memory_space<vmem>>, vector<16x8xf32>
    %c0_1 = arith.constant 0 : index
    %c0_2 = arith.constant 0 : index
    %1 = vector.load %arg5[%c0_1, %c0_2] : memref<8x16xf32, #tpu.memory_space<vmem>>, vector<8x16xf32>
    %c0_3 = arith.constant 0 : index
    %c0_4 = arith.constant 0 : index
    %2 = vector.load %arg4[%c0_3, %c0_4] : memref<16x1xf32, #tpu.memory_space<vmem>>, vector<16x1xf32>
    %c0_5 = arith.constant 0 : index
    %c0_6 = arith.constant 0 : index
    %3 = vector.load %arg6[%c0_5, %c0_6] : memref<8x1xf32, #tpu.memory_space<vmem>>, vector<8x1xf32>
    %c0_7 = arith.constant 0 : index
    %c0_8 = arith.constant 0 : index
    %c0_9 = arith.constant 0 : index
    %4 = vector.load %arg2[%c0_7, %c0_8, %c0_9] : memref<2x8x128xf32, #tpu.memory_space<vmem>>, vector<1x8x128xf32>
    %5 = vector.shape_cast %4 : vector<1x8x128xf32> to vector<8x128xf32>
    %cst = arith.constant dense<0.000000e+00> : vector<128xf32>
    %6 = vector.multi_reduction <add>, %5, %cst [0] : vector<8x128xf32> to vector<128xf32>
    %7 = vector.shape_cast %6 : vector<128xf32> to vector<1x128xf32>
    %cst_10 = arith.constant 8.000000e+00 : f32
    %8 = vector.broadcast %cst_10 : f32 to vector<1x128xf32>
    %9 = arith.divf %7, %8 : vector<1x128xf32>
    %10 = vector.broadcast %9 : vector<1x128xf32> to vector<8x128xf32>
    %11 = arith.subf %5, %10 : vector<8x128xf32>
    %12 = arith.mulf %11, %11 : vector<8x128xf32>
    %cst_11 = arith.constant dense<0.000000e+00> : vector<128xf32>
    %13 = vector.multi_reduction <add>, %12, %cst_11 [0] : vector<8x128xf32> to vector<128xf32>
    %14 = vector.shape_cast %13 : vector<128xf32> to vector<1x128xf32>
    %cst_12 = arith.constant 8.000000e+00 : f32
    %15 = vector.broadcast %cst_12 : f32 to vector<1x128xf32>
    %16 = arith.divf %14, %15 : vector<1x128xf32>
    %cst_13 = arith.constant 9.99999974E-6 : f32
    %17 = vector.broadcast %cst_13 : f32 to vector<1x128xf32>
    %18 = arith.addf %16, %17 : vector<1x128xf32>
    %19 = math.rsqrt %18 : vector<1x128xf32>
    %20 = vector.broadcast %19 : vector<1x128xf32> to vector<8x128xf32>
    %21 = arith.mulf %11, %20 : vector<8x128xf32>
    %cst_14 = arith.constant dense<0.000000e+00> : vector<16x128xf32>
    %22 = tpu.matmul %0, %21, %cst_14 {dimension_numbers = #tpu.dot_dimension_numbers<[1], [0], [0], [1], [0, 0, 1, 1], [], []>} : vector<16x8xf32>, vector<8x128xf32>, vector<16x128xf32> -> vector<16x128xf32>
    %23 = vector.broadcast %2 : vector<16x1xf32> to vector<16x128xf32>
    %24 = arith.addf %22, %23 : vector<16x128xf32>
    %cst_15 = arith.constant 5.000000e-01 : f32
    %25 = vector.broadcast %cst_15 : f32 to vector<16x128xf32>
    %26 = arith.mulf %25, %24 : vector<16x128xf32>
    %cst_16 = arith.constant 0.707106769 : f32
    %27 = vector.broadcast %cst_16 : f32 to vector<16x128xf32>
    %28 = arith.mulf %24, %27 : vector<16x128xf32>
    %29 = math.absf %28 : vector<16x128xf32>
    %cst_17 = arith.constant 0.327591091 : f32
    %30 = vector.broadcast %cst_17 : f32 to vector<16x128xf32>
    %31 = arith.mulf %30, %29 : vector<16x128xf32>
    %cst_18 = arith.constant 1.000000e+00 : f32
    %32 = vector.broadcast %cst_18 : f32 to vector<16x128xf32>
    %33 = arith.addf %32, %31 : vector<16x128xf32>
    %cst_19 = arith.constant 1.000000e+00 : f32
    %34 = vector.broadcast %cst_19 : f32 to vector<16x128xf32>
    %35 = arith.divf %34, %33 : vector<16x128xf32>
    %cst_20 = arith.constant 1.06140542 : f32
    %36 = vector.broadcast %cst_20 : f32 to vector<16x128xf32>
    %37 = arith.mulf %36, %35 : vector<16x128xf32>
    %cst_21 = arith.constant 1.45315206 : f32
    %38 = vector.broadcast %cst_21 : f32 to vector<16x128xf32>
    %39 = arith.subf %37, %38 : vector<16x128xf32>
    %40 = arith.mulf %39, %35 : vector<16x128xf32>
    %cst_22 = arith.constant 1.42141378 : f32
    %41 = vector.broadcast %cst_22 : f32 to vector<16x128xf32>
    %42 = arith.addf %40, %41 : vector<16x128xf32>
    %43 = arith.mulf %42, %35 : vector<16x128xf32>
    %cst_23 = arith.constant 0.284496725 : f32
    %44 = vector.broadcast %cst_23 : f32 to vector<16x128xf32>
    %45 = arith.subf %43, %44 : vector<16x128xf32>
    %46 = arith.mulf %45, %35 : vector<16x128xf32>
    %cst_24 = arith.constant 0.254829586 : f32
    %47 = vector.broadcast %cst_24 : f32 to vector<16x128xf32>
    %48 = arith.addf %46, %47 : vector<16x128xf32>
    %49 = arith.mulf %48, %35 : vector<16x128xf32>
    %50 = arith.mulf %29, %29 : vector<16x128xf32>
    %cst_25 = arith.constant 0.000000e+00 : f32
    %51 = vector.broadcast %cst_25 : f32 to vector<16x128xf32>
    %52 = arith.subf %51, %50 : vector<16x128xf32>
    %53 = math.exp %52 : vector<16x128xf32>
    %54 = arith.mulf %49, %53 : vector<16x128xf32>
    %cst_26 = arith.constant 1.000000e+00 : f32
    %55 = vector.broadcast %cst_26 : f32 to vector<16x128xf32>
    %56 = arith.subf %55, %54 : vector<16x128xf32>
    %cst_27 = arith.constant 0.000000e+00 : f32
    %57 = vector.broadcast %cst_27 : f32 to vector<16x128xf32>
    %58 = arith.cmpf olt, %28, %57 : vector<16x128xf32>
    %cst_28 = arith.constant 0.000000e+00 : f32
    %59 = vector.broadcast %cst_28 : f32 to vector<16x128xf32>
    %60 = arith.subf %59, %56 : vector<16x128xf32>
    %61 = arith.select %58, %60, %56 : vector<16x128xi1>, vector<16x128xf32>
    %cst_29 = arith.constant 1.000000e+00 : f32
    %62 = vector.broadcast %cst_29 : f32 to vector<16x128xf32>
    %63 = arith.addf %62, %61 : vector<16x128xf32>
    %64 = arith.mulf %26, %63 : vector<16x128xf32>
    %cst_30 = arith.constant dense<0.000000e+00> : vector<8x128xf32>
    %65 = tpu.matmul %1, %64, %cst_30 {dimension_numbers = #tpu.dot_dimension_numbers<[1], [0], [0], [1], [0, 0, 1, 1], [], []>} : vector<8x16xf32>, vector<16x128xf32>, vector<8x128xf32> -> vector<8x128xf32>
    %66 = vector.broadcast %3 : vector<8x1xf32> to vector<8x128xf32>
    %67 = arith.addf %65, %66 : vector<8x128xf32>
    %68 = arith.addf %67, %5 : vector<8x128xf32>
    %c0_31 = arith.constant 0 : index
    %c0_32 = arith.constant 0 : index
    %c0_33 = arith.constant 0 : index
    %69 = vector.load %arg7[%c0_31, %c0_32, %c0_33] : memref<2x8x128xf32, #tpu.memory_space<vmem>>, vector<1x8x128xf32>
    %70 = vector.shape_cast %69 : vector<1x8x128xf32> to vector<8x128xf32>
    %71 = vector.shape_cast %68 : vector<8x128xf32> to vector<1x8x128xf32>
    tpu.vector_store %arg7[%c0_31, %c0_32, %c0_33], %71 {strides = array<i32>} : memref<2x8x128xf32, #tpu.memory_space<vmem>>, vector<1x8x128xf32>,
    %c1 = arith.constant 1 : index
    %c0_34 = arith.constant 0 : index
    %c0_35 = arith.constant 0 : index
    %72 = vector.load %arg2[%c1, %c0_34, %c0_35] : memref<2x8x128xf32, #tpu.memory_space<vmem>>, vector<1x8x128xf32>
    %73 = vector.shape_cast %72 : vector<1x8x128xf32> to vector<8x128xf32>
    %cst_36 = arith.constant dense<0.000000e+00> : vector<128xf32>
    %74 = vector.multi_reduction <add>, %73, %cst_36 [0] : vector<8x128xf32> to vector<128xf32>
    %75 = vector.shape_cast %74 : vector<128xf32> to vector<1x128xf32>
    %cst_37 = arith.constant 8.000000e+00 : f32
    %76 = vector.broadcast %cst_37 : f32 to vector<1x128xf32>
    %77 = arith.divf %75, %76 : vector<1x128xf32>
    %78 = vector.broadcast %77 : vector<1x128xf32> to vector<8x128xf32>
    %79 = arith.subf %73, %78 : vector<8x128xf32>
    %80 = arith.mulf %79, %79 : vector<8x128xf32>
    %cst_38 = arith.constant dense<0.000000e+00> : vector<128xf32>
    %81 = vector.multi_reduction <add>, %80, %cst_38 [0] : vector<8x128xf32> to vector<128xf32>
    %82 = vector.shape_cast %81 : vector<128xf32> to vector<1x128xf32>
    %cst_39 = arith.constant 8.000000e+00 : f32
    %83 = vector.broadcast %cst_39 : f32 to vector<1x128xf32>
    %84 = arith.divf %82, %83 : vector<1x128xf32>
    %cst_40 = arith.constant 9.99999974E-6 : f32
    %85 = vector.broadcast %cst_40 : f32 to vector<1x128xf32>
    %86 = arith.addf %84, %85 : vector<1x128xf32>
    %87 = math.rsqrt %86 : vector<1x128xf32>
    %88 = vector.broadcast %87 : vector<1x128xf32> to vector<8x128xf32>
    %89 = arith.mulf %79, %88 : vector<8x128xf32>
    %cst_41 = arith.constant dense<0.000000e+00> : vector<16x128xf32>
    %90 = tpu.matmul %0, %89, %cst_41 {dimension_numbers = #tpu.dot_dimension_numbers<[1], [0], [0], [1], [0, 0, 1, 1], [], []>} : vector<16x8xf32>, vector<8x128xf32>, vector<16x128xf32> -> vector<16x128xf32>
    %91 = vector.broadcast %2 : vector<16x1xf32> to vector<16x128xf32>
    %92 = arith.addf %90, %91 : vector<16x128xf32>
    %cst_42 = arith.constant 5.000000e-01 : f32
    %93 = vector.broadcast %cst_42 : f32 to vector<16x128xf32>
    %94 = arith.mulf %93, %92 : vector<16x128xf32>
    %cst_43 = arith.constant 0.707106769 : f32
    %95 = vector.broadcast %cst_43 : f32 to vector<16x128xf32>
    %96 = arith.mulf %92, %95 : vector<16x128xf32>
    %97 = math.absf %96 : vector<16x128xf32>
    %cst_44 = arith.constant 0.327591091 : f32
    %98 = vector.broadcast %cst_44 : f32 to vector<16x128xf32>
    %99 = arith.mulf %98, %97 : vector<16x128xf32>
    %cst_45 = arith.constant 1.000000e+00 : f32
    %100 = vector.broadcast %cst_45 : f32 to vector<16x128xf32>
    %101 = arith.addf %100, %99 : vector<16x128xf32>
    %cst_46 = arith.constant 1.000000e+00 : f32
    %102 = vector.broadcast %cst_46 : f32 to vector<16x128xf32>
    %103 = arith.divf %102, %101 : vector<16x128xf32>
    %cst_47 = arith.constant 1.06140542 : f32
    %104 = vector.broadcast %cst_47 : f32 to vector<16x128xf32>
    %105 = arith.mulf %104, %103 : vector<16x128xf32>
    %cst_48 = arith.constant 1.45315206 : f32
    %106 = vector.broadcast %cst_48 : f32 to vector<16x128xf32>
    %107 = arith.subf %105, %106 : vector<16x128xf32>
    %108 = arith.mulf %107, %103 : vector<16x128xf32>
    %cst_49 = arith.constant 1.42141378 : f32
    %109 = vector.broadcast %cst_49 : f32 to vector<16x128xf32>
    %110 = arith.addf %108, %109 : vector<16x128xf32>
    %111 = arith.mulf %110, %103 : vector<16x128xf32>
    %cst_50 = arith.constant 0.284496725 : f32
    %112 = vector.broadcast %cst_50 : f32 to vector<16x128xf32>
    %113 = arith.subf %111, %112 : vector<16x128xf32>
    %114 = arith.mulf %113, %103 : vector<16x128xf32>
    %cst_51 = arith.constant 0.254829586 : f32
    %115 = vector.broadcast %cst_51 : f32 to vector<16x128xf32>
    %116 = arith.addf %114, %115 : vector<16x128xf32>
    %117 = arith.mulf %116, %103 : vector<16x128xf32>
    %118 = arith.mulf %97, %97 : vector<16x128xf32>
    %cst_52 = arith.constant 0.000000e+00 : f32
    %119 = vector.broadcast %cst_52 : f32 to vector<16x128xf32>
    %120 = arith.subf %119, %118 : vector<16x128xf32>
    %121 = math.exp %120 : vector<16x128xf32>
    %122 = arith.mulf %117, %121 : vector<16x128xf32>
    %cst_53 = arith.constant 1.000000e+00 : f32
    %123 = vector.broadcast %cst_53 : f32 to vector<16x128xf32>
    %124 = arith.subf %123, %122 : vector<16x128xf32>
    %cst_54 = arith.constant 0.000000e+00 : f32
    %125 = vector.broadcast %cst_54 : f32 to vector<16x128xf32>
    %126 = arith.cmpf olt, %96, %125 : vector<16x128xf32>
    %cst_55 = arith.constant 0.000000e+00 : f32
    %127 = vector.broadcast %cst_55 : f32 to vector<16x128xf32>
    %128 = arith.subf %127, %124 : vector<16x128xf32>
    %129 = arith.select %126, %128, %124 : vector<16x128xi1>, vector<16x128xf32>
    %cst_56 = arith.constant 1.000000e+00 : f32
    %130 = vector.broadcast %cst_56 : f32 to vector<16x128xf32>
    %131 = arith.addf %130, %129 : vector<16x128xf32>
    %132 = arith.mulf %94, %131 : vector<16x128xf32>
    %cst_57 = arith.constant dense<0.000000e+00> : vector<8x128xf32>
    %133 = tpu.matmul %1, %132, %cst_57 {dimension_numbers = #tpu.dot_dimension_numbers<[1], [0], [0], [1], [0, 0, 1, 1], [], []>} : vector<8x16xf32>, vector<16x128xf32>, vector<8x128xf32> -> vector<8x128xf32>
    %134 = vector.broadcast %3 : vector<8x1xf32> to vector<8x128xf32>
    %135 = arith.addf %133, %134 : vector<8x128xf32>
    %136 = arith.addf %135, %73 : vector<8x128xf32>
    %c1_58 = arith.constant 1 : index
    %c0_59 = arith.constant 0 : index
    %c0_60 = arith.constant 0 : index
    %137 = vector.load %arg7[%c1_58, %c0_59, %c0_60] : memref<2x8x128xf32, #tpu.memory_space<vmem>>, vector<1x8x128xf32>
    %138 = vector.shape_cast %137 : vector<1x8x128xf32> to vector<8x128xf32>
    %139 = vector.shape_cast %136 : vector<8x128xf32> to vector<1x8x128xf32>
    tpu.vector_store %arg7[%c1_58, %c0_59, %c0_60], %139 {strides = array<i32>} : memref<2x8x128xf32, #tpu.memory_space<vmem>>, vector<1x8x128xf32>,
    return
  }
  func.func @transform_0(%arg0: i32, %arg1: i32) -> (i32, i32, i32) {
    %c0_i32 = arith.constant 0 : i32
    %c0_i32_0 = arith.constant 0 : i32
    return %arg0, %c0_i32, %arg1 : i32, i32, i32
  }
  func.func @transform_1(%arg0: i32, %arg1: i32) -> (i32, i32) {
    %c0_i32 = arith.constant 0 : i32
    %c0_i32_0 = arith.constant 0 : i32
    %c0_i32_1 = arith.constant 0 : i32
    return %c0_i32, %c0_i32_0 : i32, i32
  }
  func.func @transform_2(%arg0: i32, %arg1: i32) -> (i32, i32) {
    %c0_i32 = arith.constant 0 : i32
    %c0_i32_0 = arith.constant 0 : i32
    %c0_i32_1 = arith.constant 0 : i32
    return %c0_i32, %c0_i32_0 : i32, i32
  }
  func.func @transform_3(%arg0: i32, %arg1: i32) -> (i32, i32) {
    %c0_i32 = arith.constant 0 : i32
    %c0_i32_0 = arith.constant 0 : i32
    %c0_i32_1 = arith.constant 0 : i32
    return %c0_i32, %c0_i32_0 : i32, i32
  }
  func.func @transform_4(%arg0: i32, %arg1: i32) -> (i32, i32) {
    %c0_i32 = arith.constant 0 : i32
    %c0_i32_0 = arith.constant 0 : i32
    %c0_i32_1 = arith.constant 0 : i32
    return %c0_i32, %c0_i32_0 : i32, i32
  }
  func.func @transform_5(%arg0: i32, %arg1: i32) -> (i32, i32, i32) {
    %c0_i32 = arith.constant 0 : i32
    %c0_i32_0 = arith.constant 0 : i32
    return %arg0, %c0_i32, %arg1 : i32, i32, i32
  }
}

module attributes {stable_mosaic.version = 11 : i64} {
  func.func @_ln_q_xhat_kernel(%arg0: i32, %arg1: i32, %arg2: memref<2x8x128xf32, #tpu.memory_space<vmem>>, %arg3: memref<8x8xf32, #tpu.memory_space<vmem>>, %arg4: memref<8x1xf32, #tpu.memory_space<vmem>>, %arg5: memref<2x8x128xf32, #tpu.memory_space<vmem>>, %arg6: memref<2x8x128xf32, #tpu.memory_space<vmem>>) attributes {dimension_semantics = [#tpu.dimension_semantics<parallel>, #tpu.dimension_semantics<parallel>], iteration_bounds = array<i64: 1, 1>, scalar_prefetch = 0 : i64, scratch_operands = 0 : i64, tpu.core_type = #tpu.core_type<tc>, window_params = [{transform_indices = @transform_0, window_bounds = array<i64: 2, 8, 128>}, {pipeline_mode = #tpu.pipeline_mode<synchronous>, transform_indices = @transform_1, window_bounds = array<i64: 8, 8>}, {pipeline_mode = #tpu.pipeline_mode<synchronous>, transform_indices = @transform_2, window_bounds = array<i64: 8, 1>}, {transform_indices = @transform_3, window_bounds = array<i64: 2, 8, 128>}, {transform_indices = @transform_4, window_bounds = array<i64: 2, 8, 128>}]} {
    %c0 = arith.constant 0 : index
    %c0_0 = arith.constant 0 : index
    %0 = vector.load %arg3[%c0, %c0_0] : memref<8x8xf32, #tpu.memory_space<vmem>>, vector<8x8xf32>
    %c0_1 = arith.constant 0 : index
    %c0_2 = arith.constant 0 : index
    %1 = vector.load %arg4[%c0_1, %c0_2] : memref<8x1xf32, #tpu.memory_space<vmem>>, vector<8x1xf32>
    %c0_3 = arith.constant 0 : index
    %c0_4 = arith.constant 0 : index
    %c0_5 = arith.constant 0 : index
    %2 = vector.load %arg2[%c0_3, %c0_4, %c0_5] : memref<2x8x128xf32, #tpu.memory_space<vmem>>, vector<1x8x128xf32>
    %3 = vector.shape_cast %2 : vector<1x8x128xf32> to vector<8x128xf32>
    %cst = arith.constant dense<0.000000e+00> : vector<128xf32>
    %4 = vector.multi_reduction <add>, %3, %cst [0] : vector<8x128xf32> to vector<128xf32>
    %5 = vector.shape_cast %4 : vector<128xf32> to vector<1x128xf32>
    %cst_6 = arith.constant 8.000000e+00 : f32
    %6 = vector.broadcast %cst_6 : f32 to vector<1x128xf32>
    %7 = arith.divf %5, %6 : vector<1x128xf32>
    %8 = vector.broadcast %7 : vector<1x128xf32> to vector<8x128xf32>
    %9 = arith.subf %3, %8 : vector<8x128xf32>
    %10 = arith.mulf %9, %9 : vector<8x128xf32>
    %cst_7 = arith.constant dense<0.000000e+00> : vector<128xf32>
    %11 = vector.multi_reduction <add>, %10, %cst_7 [0] : vector<8x128xf32> to vector<128xf32>
    %12 = vector.shape_cast %11 : vector<128xf32> to vector<1x128xf32>
    %cst_8 = arith.constant 8.000000e+00 : f32
    %13 = vector.broadcast %cst_8 : f32 to vector<1x128xf32>
    %14 = arith.divf %12, %13 : vector<1x128xf32>
    %cst_9 = arith.constant 9.99999974E-6 : f32
    %15 = vector.broadcast %cst_9 : f32 to vector<1x128xf32>
    %16 = arith.addf %14, %15 : vector<1x128xf32>
    %17 = math.rsqrt %16 : vector<1x128xf32>
    %18 = vector.broadcast %17 : vector<1x128xf32> to vector<8x128xf32>
    %19 = arith.mulf %9, %18 : vector<8x128xf32>
    %c0_10 = arith.constant 0 : index
    %c0_11 = arith.constant 0 : index
    %c0_12 = arith.constant 0 : index
    %20 = vector.load %arg6[%c0_10, %c0_11, %c0_12] : memref<2x8x128xf32, #tpu.memory_space<vmem>>, vector<1x8x128xf32>
    %21 = vector.shape_cast %20 : vector<1x8x128xf32> to vector<8x128xf32>
    %22 = vector.shape_cast %19 : vector<8x128xf32> to vector<1x8x128xf32>
    tpu.vector_store %arg6[%c0_10, %c0_11, %c0_12], %22 {strides = array<i32>} : memref<2x8x128xf32, #tpu.memory_space<vmem>>, vector<1x8x128xf32>,
    %cst_13 = arith.constant dense<0.000000e+00> : vector<8x128xf32>
    %23 = tpu.matmul %0, %19, %cst_13 {dimension_numbers = #tpu.dot_dimension_numbers<[1], [0], [0], [1], [0, 0, 1, 1], [], []>} : vector<8x8xf32>, vector<8x128xf32>, vector<8x128xf32> -> vector<8x128xf32>
    %24 = vector.broadcast %1 : vector<8x1xf32> to vector<8x128xf32>
    %25 = arith.addf %23, %24 : vector<8x128xf32>
    %c0_14 = arith.constant 0 : index
    %c0_15 = arith.constant 0 : index
    %c0_16 = arith.constant 0 : index
    %26 = vector.load %arg5[%c0_14, %c0_15, %c0_16] : memref<2x8x128xf32, #tpu.memory_space<vmem>>, vector<1x8x128xf32>
    %27 = vector.shape_cast %26 : vector<1x8x128xf32> to vector<8x128xf32>
    %28 = vector.shape_cast %25 : vector<8x128xf32> to vector<1x8x128xf32>
    tpu.vector_store %arg5[%c0_14, %c0_15, %c0_16], %28 {strides = array<i32>} : memref<2x8x128xf32, #tpu.memory_space<vmem>>, vector<1x8x128xf32>,
    %c1 = arith.constant 1 : index
    %c0_17 = arith.constant 0 : index
    %c0_18 = arith.constant 0 : index
    %29 = vector.load %arg2[%c1, %c0_17, %c0_18] : memref<2x8x128xf32, #tpu.memory_space<vmem>>, vector<1x8x128xf32>
    %30 = vector.shape_cast %29 : vector<1x8x128xf32> to vector<8x128xf32>
    %cst_19 = arith.constant dense<0.000000e+00> : vector<128xf32>
    %31 = vector.multi_reduction <add>, %30, %cst_19 [0] : vector<8x128xf32> to vector<128xf32>
    %32 = vector.shape_cast %31 : vector<128xf32> to vector<1x128xf32>
    %cst_20 = arith.constant 8.000000e+00 : f32
    %33 = vector.broadcast %cst_20 : f32 to vector<1x128xf32>
    %34 = arith.divf %32, %33 : vector<1x128xf32>
    %35 = vector.broadcast %34 : vector<1x128xf32> to vector<8x128xf32>
    %36 = arith.subf %30, %35 : vector<8x128xf32>
    %37 = arith.mulf %36, %36 : vector<8x128xf32>
    %cst_21 = arith.constant dense<0.000000e+00> : vector<128xf32>
    %38 = vector.multi_reduction <add>, %37, %cst_21 [0] : vector<8x128xf32> to vector<128xf32>
    %39 = vector.shape_cast %38 : vector<128xf32> to vector<1x128xf32>
    %cst_22 = arith.constant 8.000000e+00 : f32
    %40 = vector.broadcast %cst_22 : f32 to vector<1x128xf32>
    %41 = arith.divf %39, %40 : vector<1x128xf32>
    %cst_23 = arith.constant 9.99999974E-6 : f32
    %42 = vector.broadcast %cst_23 : f32 to vector<1x128xf32>
    %43 = arith.addf %41, %42 : vector<1x128xf32>
    %44 = math.rsqrt %43 : vector<1x128xf32>
    %45 = vector.broadcast %44 : vector<1x128xf32> to vector<8x128xf32>
    %46 = arith.mulf %36, %45 : vector<8x128xf32>
    %c1_24 = arith.constant 1 : index
    %c0_25 = arith.constant 0 : index
    %c0_26 = arith.constant 0 : index
    %47 = vector.load %arg6[%c1_24, %c0_25, %c0_26] : memref<2x8x128xf32, #tpu.memory_space<vmem>>, vector<1x8x128xf32>
    %48 = vector.shape_cast %47 : vector<1x8x128xf32> to vector<8x128xf32>
    %49 = vector.shape_cast %46 : vector<8x128xf32> to vector<1x8x128xf32>
    tpu.vector_store %arg6[%c1_24, %c0_25, %c0_26], %49 {strides = array<i32>} : memref<2x8x128xf32, #tpu.memory_space<vmem>>, vector<1x8x128xf32>,
    %cst_27 = arith.constant dense<0.000000e+00> : vector<8x128xf32>
    %50 = tpu.matmul %0, %46, %cst_27 {dimension_numbers = #tpu.dot_dimension_numbers<[1], [0], [0], [1], [0, 0, 1, 1], [], []>} : vector<8x8xf32>, vector<8x128xf32>, vector<8x128xf32> -> vector<8x128xf32>
    %51 = vector.broadcast %1 : vector<8x1xf32> to vector<8x128xf32>
    %52 = arith.addf %50, %51 : vector<8x128xf32>
    %c1_28 = arith.constant 1 : index
    %c0_29 = arith.constant 0 : index
    %c0_30 = arith.constant 0 : index
    %53 = vector.load %arg5[%c1_28, %c0_29, %c0_30] : memref<2x8x128xf32, #tpu.memory_space<vmem>>, vector<1x8x128xf32>
    %54 = vector.shape_cast %53 : vector<1x8x128xf32> to vector<8x128xf32>
    %55 = vector.shape_cast %52 : vector<8x128xf32> to vector<1x8x128xf32>
    tpu.vector_store %arg5[%c1_28, %c0_29, %c0_30], %55 {strides = array<i32>} : memref<2x8x128xf32, #tpu.memory_space<vmem>>, vector<1x8x128xf32>,
    return
  }
  func.func @transform_0(%arg0: i32, %arg1: i32) -> (i32, i32, i32) {
    %c0_i32 = arith.constant 0 : i32
    %c0_i32_0 = arith.constant 0 : i32
    return %arg0, %c0_i32, %arg1 : i32, i32, i32
  }
  func.func @transform_1(%arg0: i32, %arg1: i32) -> (i32, i32) {
    %c0_i32 = arith.constant 0 : i32
    %c0_i32_0 = arith.constant 0 : i32
    %c0_i32_1 = arith.constant 0 : i32
    return %c0_i32, %c0_i32_0 : i32, i32
  }
  func.func @transform_2(%arg0: i32, %arg1: i32) -> (i32, i32) {
    %c0_i32 = arith.constant 0 : i32
    %c0_i32_0 = arith.constant 0 : i32
    %c0_i32_1 = arith.constant 0 : i32
    return %c0_i32, %c0_i32_0 : i32, i32
  }
  func.func @transform_3(%arg0: i32, %arg1: i32) -> (i32, i32, i32) {
    %c0_i32 = arith.constant 0 : i32
    %c0_i32_0 = arith.constant 0 : i32
    return %arg0, %c0_i32, %arg1 : i32, i32, i32
  }
  func.func @transform_4(%arg0: i32, %arg1: i32) -> (i32, i32, i32) {
    %c0_i32 = arith.constant 0 : i32
    %c0_i32_0 = arith.constant 0 : i32
    return %arg0, %c0_i32, %arg1 : i32, i32, i32
  }
}

module attributes {stable_mosaic.version = 11 : i64} {
  func.func @_ff_kernel(%arg0: i32, %arg1: i32, %arg2: memref<2x8x128xf32, #tpu.memory_space<vmem>>, %arg3: memref<16x8xf32, #tpu.memory_space<vmem>>, %arg4: memref<16x1xf32, #tpu.memory_space<vmem>>, %arg5: memref<8x16xf32, #tpu.memory_space<vmem>>, %arg6: memref<8x1xf32, #tpu.memory_space<vmem>>, %arg7: memref<2x8x128xf32, #tpu.memory_space<vmem>>) attributes {dimension_semantics = [#tpu.dimension_semantics<parallel>, #tpu.dimension_semantics<parallel>], iteration_bounds = array<i64: 1, 1>, scalar_prefetch = 0 : i64, scratch_operands = 0 : i64, tpu.core_type = #tpu.core_type<tc>, window_params = [{transform_indices = @transform_0, window_bounds = array<i64: 2, 8, 128>}, {pipeline_mode = #tpu.pipeline_mode<synchronous>, transform_indices = @transform_1, window_bounds = array<i64: 16, 8>}, {pipeline_mode = #tpu.pipeline_mode<synchronous>, transform_indices = @transform_2, window_bounds = array<i64: 16, 1>}, {pipeline_mode = #tpu.pipeline_mode<synchronous>, transform_indices = @transform_3, window_bounds = array<i64: 8, 16>}, {pipeline_mode = #tpu.pipeline_mode<synchronous>, transform_indices = @transform_4, window_bounds = array<i64: 8, 1>}, {transform_indices = @transform_5, window_bounds = array<i64: 2, 8, 128>}]} {
    %c0 = arith.constant 0 : index
    %c0_0 = arith.constant 0 : index
    %0 = vector.load %arg3[%c0, %c0_0] : memref<16x8xf32, #tpu.memory_space<vmem>>, vector<16x8xf32>
    %c0_1 = arith.constant 0 : index
    %c0_2 = arith.constant 0 : index
    %1 = vector.load %arg5[%c0_1, %c0_2] : memref<8x16xf32, #tpu.memory_space<vmem>>, vector<8x16xf32>
    %c0_3 = arith.constant 0 : index
    %c0_4 = arith.constant 0 : index
    %2 = vector.load %arg4[%c0_3, %c0_4] : memref<16x1xf32, #tpu.memory_space<vmem>>, vector<16x1xf32>
    %c0_5 = arith.constant 0 : index
    %c0_6 = arith.constant 0 : index
    %3 = vector.load %arg6[%c0_5, %c0_6] : memref<8x1xf32, #tpu.memory_space<vmem>>, vector<8x1xf32>
    %c0_7 = arith.constant 0 : index
    %c0_8 = arith.constant 0 : index
    %c0_9 = arith.constant 0 : index
    %4 = vector.load %arg2[%c0_7, %c0_8, %c0_9] : memref<2x8x128xf32, #tpu.memory_space<vmem>>, vector<1x8x128xf32>
    %5 = vector.shape_cast %4 : vector<1x8x128xf32> to vector<8x128xf32>
    %cst = arith.constant dense<0.000000e+00> : vector<128xf32>
    %6 = vector.multi_reduction <add>, %5, %cst [0] : vector<8x128xf32> to vector<128xf32>
    %7 = vector.shape_cast %6 : vector<128xf32> to vector<1x128xf32>
    %cst_10 = arith.constant 8.000000e+00 : f32
    %8 = vector.broadcast %cst_10 : f32 to vector<1x128xf32>
    %9 = arith.divf %7, %8 : vector<1x128xf32>
    %10 = vector.broadcast %9 : vector<1x128xf32> to vector<8x128xf32>
    %11 = arith.subf %5, %10 : vector<8x128xf32>
    %12 = arith.mulf %11, %11 : vector<8x128xf32>
    %cst_11 = arith.constant dense<0.000000e+00> : vector<128xf32>
    %13 = vector.multi_reduction <add>, %12, %cst_11 [0] : vector<8x128xf32> to vector<128xf32>
    %14 = vector.shape_cast %13 : vector<128xf32> to vector<1x128xf32>
    %cst_12 = arith.constant 8.000000e+00 : f32
    %15 = vector.broadcast %cst_12 : f32 to vector<1x128xf32>
    %16 = arith.divf %14, %15 : vector<1x128xf32>
    %cst_13 = arith.constant 9.99999974E-6 : f32
    %17 = vector.broadcast %cst_13 : f32 to vector<1x128xf32>
    %18 = arith.addf %16, %17 : vector<1x128xf32>
    %19 = math.rsqrt %18 : vector<1x128xf32>
    %20 = vector.broadcast %19 : vector<1x128xf32> to vector<8x128xf32>
    %21 = arith.mulf %11, %20 : vector<8x128xf32>
    %cst_14 = arith.constant dense<0.000000e+00> : vector<16x128xf32>
    %22 = tpu.matmul %0, %21, %cst_14 {dimension_numbers = #tpu.dot_dimension_numbers<[1], [0], [0], [1], [0, 0, 1, 1], [], []>} : vector<16x8xf32>, vector<8x128xf32>, vector<16x128xf32> -> vector<16x128xf32>
    %23 = vector.broadcast %2 : vector<16x1xf32> to vector<16x128xf32>
    %24 = arith.addf %22, %23 : vector<16x128xf32>
    %cst_15 = arith.constant 5.000000e-01 : f32
    %25 = vector.broadcast %cst_15 : f32 to vector<16x128xf32>
    %26 = arith.mulf %25, %24 : vector<16x128xf32>
    %cst_16 = arith.constant 0.707106769 : f32
    %27 = vector.broadcast %cst_16 : f32 to vector<16x128xf32>
    %28 = arith.mulf %24, %27 : vector<16x128xf32>
    %29 = math.absf %28 : vector<16x128xf32>
    %cst_17 = arith.constant 0.327591091 : f32
    %30 = vector.broadcast %cst_17 : f32 to vector<16x128xf32>
    %31 = arith.mulf %30, %29 : vector<16x128xf32>
    %cst_18 = arith.constant 1.000000e+00 : f32
    %32 = vector.broadcast %cst_18 : f32 to vector<16x128xf32>
    %33 = arith.addf %32, %31 : vector<16x128xf32>
    %cst_19 = arith.constant 1.000000e+00 : f32
    %34 = vector.broadcast %cst_19 : f32 to vector<16x128xf32>
    %35 = arith.divf %34, %33 : vector<16x128xf32>
    %cst_20 = arith.constant 1.06140542 : f32
    %36 = vector.broadcast %cst_20 : f32 to vector<16x128xf32>
    %37 = arith.mulf %36, %35 : vector<16x128xf32>
    %cst_21 = arith.constant 1.45315206 : f32
    %38 = vector.broadcast %cst_21 : f32 to vector<16x128xf32>
    %39 = arith.subf %37, %38 : vector<16x128xf32>
    %40 = arith.mulf %39, %35 : vector<16x128xf32>
    %cst_22 = arith.constant 1.42141378 : f32
    %41 = vector.broadcast %cst_22 : f32 to vector<16x128xf32>
    %42 = arith.addf %40, %41 : vector<16x128xf32>
    %43 = arith.mulf %42, %35 : vector<16x128xf32>
    %cst_23 = arith.constant 0.284496725 : f32
    %44 = vector.broadcast %cst_23 : f32 to vector<16x128xf32>
    %45 = arith.subf %43, %44 : vector<16x128xf32>
    %46 = arith.mulf %45, %35 : vector<16x128xf32>
    %cst_24 = arith.constant 0.254829586 : f32
    %47 = vector.broadcast %cst_24 : f32 to vector<16x128xf32>
    %48 = arith.addf %46, %47 : vector<16x128xf32>
    %49 = arith.mulf %48, %35 : vector<16x128xf32>
    %50 = arith.mulf %29, %29 : vector<16x128xf32>
    %cst_25 = arith.constant 0.000000e+00 : f32
    %51 = vector.broadcast %cst_25 : f32 to vector<16x128xf32>
    %52 = arith.subf %51, %50 : vector<16x128xf32>
    %53 = math.exp %52 : vector<16x128xf32>
    %54 = arith.mulf %49, %53 : vector<16x128xf32>
    %cst_26 = arith.constant 1.000000e+00 : f32
    %55 = vector.broadcast %cst_26 : f32 to vector<16x128xf32>
    %56 = arith.subf %55, %54 : vector<16x128xf32>
    %cst_27 = arith.constant 0.000000e+00 : f32
    %57 = vector.broadcast %cst_27 : f32 to vector<16x128xf32>
    %58 = arith.cmpf olt, %28, %57 : vector<16x128xf32>
    %cst_28 = arith.constant 0.000000e+00 : f32
    %59 = vector.broadcast %cst_28 : f32 to vector<16x128xf32>
    %60 = arith.subf %59, %56 : vector<16x128xf32>
    %61 = arith.select %58, %60, %56 : vector<16x128xi1>, vector<16x128xf32>
    %cst_29 = arith.constant 1.000000e+00 : f32
    %62 = vector.broadcast %cst_29 : f32 to vector<16x128xf32>
    %63 = arith.addf %62, %61 : vector<16x128xf32>
    %64 = arith.mulf %26, %63 : vector<16x128xf32>
    %cst_30 = arith.constant dense<0.000000e+00> : vector<8x128xf32>
    %65 = tpu.matmul %1, %64, %cst_30 {dimension_numbers = #tpu.dot_dimension_numbers<[1], [0], [0], [1], [0, 0, 1, 1], [], []>} : vector<8x16xf32>, vector<16x128xf32>, vector<8x128xf32> -> vector<8x128xf32>
    %66 = vector.broadcast %3 : vector<8x1xf32> to vector<8x128xf32>
    %67 = arith.addf %65, %66 : vector<8x128xf32>
    %68 = arith.addf %67, %5 : vector<8x128xf32>
    %c0_31 = arith.constant 0 : index
    %c0_32 = arith.constant 0 : index
    %c0_33 = arith.constant 0 : index
    %69 = vector.load %arg7[%c0_31, %c0_32, %c0_33] : memref<2x8x128xf32, #tpu.memory_space<vmem>>, vector<1x8x128xf32>
    %70 = vector.shape_cast %69 : vector<1x8x128xf32> to vector<8x128xf32>
    %71 = vector.shape_cast %68 : vector<8x128xf32> to vector<1x8x128xf32>
    tpu.vector_store %arg7[%c0_31, %c0_32, %c0_33], %71 {strides = array<i32>} : memref<2x8x128xf32, #tpu.memory_space<vmem>>, vector<1x8x128xf32>,
    %c1 = arith.constant 1 : index
    %c0_34 = arith.constant 0 : index
    %c0_35 = arith.constant 0 : index
    %72 = vector.load %arg2[%c1, %c0_34, %c0_35] : memref<2x8x128xf32, #tpu.memory_space<vmem>>, vector<1x8x128xf32>
    %73 = vector.shape_cast %72 : vector<1x8x128xf32> to vector<8x128xf32>
    %cst_36 = arith.constant dense<0.000000e+00> : vector<128xf32>
    %74 = vector.multi_reduction <add>, %73, %cst_36 [0] : vector<8x128xf32> to vector<128xf32>
    %75 = vector.shape_cast %74 : vector<128xf32> to vector<1x128xf32>
    %cst_37 = arith.constant 8.000000e+00 : f32
    %76 = vector.broadcast %cst_37 : f32 to vector<1x128xf32>
    %77 = arith.divf %75, %76 : vector<1x128xf32>
    %78 = vector.broadcast %77 : vector<1x128xf32> to vector<8x128xf32>
    %79 = arith.subf %73, %78 : vector<8x128xf32>
    %80 = arith.mulf %79, %79 : vector<8x128xf32>
    %cst_38 = arith.constant dense<0.000000e+00> : vector<128xf32>
    %81 = vector.multi_reduction <add>, %80, %cst_38 [0] : vector<8x128xf32> to vector<128xf32>
    %82 = vector.shape_cast %81 : vector<128xf32> to vector<1x128xf32>
    %cst_39 = arith.constant 8.000000e+00 : f32
    %83 = vector.broadcast %cst_39 : f32 to vector<1x128xf32>
    %84 = arith.divf %82, %83 : vector<1x128xf32>
    %cst_40 = arith.constant 9.99999974E-6 : f32
    %85 = vector.broadcast %cst_40 : f32 to vector<1x128xf32>
    %86 = arith.addf %84, %85 : vector<1x128xf32>
    %87 = math.rsqrt %86 : vector<1x128xf32>
    %88 = vector.broadcast %87 : vector<1x128xf32> to vector<8x128xf32>
    %89 = arith.mulf %79, %88 : vector<8x128xf32>
    %cst_41 = arith.constant dense<0.000000e+00> : vector<16x128xf32>
    %90 = tpu.matmul %0, %89, %cst_41 {dimension_numbers = #tpu.dot_dimension_numbers<[1], [0], [0], [1], [0, 0, 1, 1], [], []>} : vector<16x8xf32>, vector<8x128xf32>, vector<16x128xf32> -> vector<16x128xf32>
    %91 = vector.broadcast %2 : vector<16x1xf32> to vector<16x128xf32>
    %92 = arith.addf %90, %91 : vector<16x128xf32>
    %cst_42 = arith.constant 5.000000e-01 : f32
    %93 = vector.broadcast %cst_42 : f32 to vector<16x128xf32>
    %94 = arith.mulf %93, %92 : vector<16x128xf32>
    %cst_43 = arith.constant 0.707106769 : f32
    %95 = vector.broadcast %cst_43 : f32 to vector<16x128xf32>
    %96 = arith.mulf %92, %95 : vector<16x128xf32>
    %97 = math.absf %96 : vector<16x128xf32>
    %cst_44 = arith.constant 0.327591091 : f32
    %98 = vector.broadcast %cst_44 : f32 to vector<16x128xf32>
    %99 = arith.mulf %98, %97 : vector<16x128xf32>
    %cst_45 = arith.constant 1.000000e+00 : f32
    %100 = vector.broadcast %cst_45 : f32 to vector<16x128xf32>
    %101 = arith.addf %100, %99 : vector<16x128xf32>
    %cst_46 = arith.constant 1.000000e+00 : f32
    %102 = vector.broadcast %cst_46 : f32 to vector<16x128xf32>
    %103 = arith.divf %102, %101 : vector<16x128xf32>
    %cst_47 = arith.constant 1.06140542 : f32
    %104 = vector.broadcast %cst_47 : f32 to vector<16x128xf32>
    %105 = arith.mulf %104, %103 : vector<16x128xf32>
    %cst_48 = arith.constant 1.45315206 : f32
    %106 = vector.broadcast %cst_48 : f32 to vector<16x128xf32>
    %107 = arith.subf %105, %106 : vector<16x128xf32>
    %108 = arith.mulf %107, %103 : vector<16x128xf32>
    %cst_49 = arith.constant 1.42141378 : f32
    %109 = vector.broadcast %cst_49 : f32 to vector<16x128xf32>
    %110 = arith.addf %108, %109 : vector<16x128xf32>
    %111 = arith.mulf %110, %103 : vector<16x128xf32>
    %cst_50 = arith.constant 0.284496725 : f32
    %112 = vector.broadcast %cst_50 : f32 to vector<16x128xf32>
    %113 = arith.subf %111, %112 : vector<16x128xf32>
    %114 = arith.mulf %113, %103 : vector<16x128xf32>
    %cst_51 = arith.constant 0.254829586 : f32
    %115 = vector.broadcast %cst_51 : f32 to vector<16x128xf32>
    %116 = arith.addf %114, %115 : vector<16x128xf32>
    %117 = arith.mulf %116, %103 : vector<16x128xf32>
    %118 = arith.mulf %97, %97 : vector<16x128xf32>
    %cst_52 = arith.constant 0.000000e+00 : f32
    %119 = vector.broadcast %cst_52 : f32 to vector<16x128xf32>
    %120 = arith.subf %119, %118 : vector<16x128xf32>
    %121 = math.exp %120 : vector<16x128xf32>
    %122 = arith.mulf %117, %121 : vector<16x128xf32>
    %cst_53 = arith.constant 1.000000e+00 : f32
    %123 = vector.broadcast %cst_53 : f32 to vector<16x128xf32>
    %124 = arith.subf %123, %122 : vector<16x128xf32>
    %cst_54 = arith.constant 0.000000e+00 : f32
    %125 = vector.broadcast %cst_54 : f32 to vector<16x128xf32>
    %126 = arith.cmpf olt, %96, %125 : vector<16x128xf32>
    %cst_55 = arith.constant 0.000000e+00 : f32
    %127 = vector.broadcast %cst_55 : f32 to vector<16x128xf32>
    %128 = arith.subf %127, %124 : vector<16x128xf32>
    %129 = arith.select %126, %128, %124 : vector<16x128xi1>, vector<16x128xf32>
    %cst_56 = arith.constant 1.000000e+00 : f32
    %130 = vector.broadcast %cst_56 : f32 to vector<16x128xf32>
    %131 = arith.addf %130, %129 : vector<16x128xf32>
    %132 = arith.mulf %94, %131 : vector<16x128xf32>
    %cst_57 = arith.constant dense<0.000000e+00> : vector<8x128xf32>
    %133 = tpu.matmul %1, %132, %cst_57 {dimension_numbers = #tpu.dot_dimension_numbers<[1], [0], [0], [1], [0, 0, 1, 1], [], []>} : vector<8x16xf32>, vector<16x128xf32>, vector<8x128xf32> -> vector<8x128xf32>
    %134 = vector.broadcast %3 : vector<8x1xf32> to vector<8x128xf32>
    %135 = arith.addf %133, %134 : vector<8x128xf32>
    %136 = arith.addf %135, %73 : vector<8x128xf32>
    %c1_58 = arith.constant 1 : index
    %c0_59 = arith.constant 0 : index
    %c0_60 = arith.constant 0 : index
    %137 = vector.load %arg7[%c1_58, %c0_59, %c0_60] : memref<2x8x128xf32, #tpu.memory_space<vmem>>, vector<1x8x128xf32>
    %138 = vector.shape_cast %137 : vector<1x8x128xf32> to vector<8x128xf32>
    %139 = vector.shape_cast %136 : vector<8x128xf32> to vector<1x8x128xf32>
    tpu.vector_store %arg7[%c1_58, %c0_59, %c0_60], %139 {strides = array<i32>} : memref<2x8x128xf32, #tpu.memory_space<vmem>>, vector<1x8x128xf32>,
    return
  }
  func.func @transform_0(%arg0: i32, %arg1: i32) -> (i32, i32, i32) {
    %c0_i32 = arith.constant 0 : i32
    %c0_i32_0 = arith.constant 0 : i32
    return %arg0, %c0_i32, %arg1 : i32, i32, i32
  }
  func.func @transform_1(%arg0: i32, %arg1: i32) -> (i32, i32) {
    %c0_i32 = arith.constant 0 : i32
    %c0_i32_0 = arith.constant 0 : i32
    %c0_i32_1 = arith.constant 0 : i32
    return %c0_i32, %c0_i32_0 : i32, i32
  }
  func.func @transform_2(%arg0: i32, %arg1: i32) -> (i32, i32) {
    %c0_i32 = arith.constant 0 : i32
    %c0_i32_0 = arith.constant 0 : i32
    %c0_i32_1 = arith.constant 0 : i32
    return %c0_i32, %c0_i32_0 : i32, i32
  }
  func.func @transform_3(%arg0: i32, %arg1: i32) -> (i32, i32) {
    %c0_i32 = arith.constant 0 : i32
    %c0_i32_0 = arith.constant 0 : i32
    %c0_i32_1 = arith.constant 0 : i32
    return %c0_i32, %c0_i32_0 : i32, i32
  }
  func.func @transform_4(%arg0: i32, %arg1: i32) -> (i32, i32) {
    %c0_i32 = arith.constant 0 : i32
    %c0_i32_0 = arith.constant 0 : i32
    %c0_i32_1 = arith.constant 0 : i32
    return %c0_i32, %c0_i32_0 : i32, i32
  }
  func.func @transform_5(%arg0: i32, %arg1: i32) -> (i32, i32, i32) {
    %c0_i32 = arith.constant 0 : i32
    %c0_i32_0 = arith.constant 0 : i32
    return %arg0, %c0_i32, %arg1 : i32, i32, i32
  }
}

</mosaic_0001>

<bundles_post_ra>
// kernel: _lambda_.12
= control target key start
LH: loop header
LB: loop body
LE: loop exit
PB: predicated region body
PF: predicated region fallthrough
CT: control target
= control target key end

     0   :  { %v307_v0 = vmov 0.0   ;;  %vm308_vm0 = vmmov 0   ;;  %v309_v6 = vmov 0   ;;  %vm56_vm1 = vcmask 64512   ;;  %s386_s0 = inlined_call_operand.vmem [shape: f32[2,8,128], index: 0, kind: input, shape index: {}]   ;;  %s387_s2 = inlined_call_operand.vmem [shape: f32[24,1], index: 2, kind: input, shape index: {}]   ;;  %s388_s1 = inlined_call_operand.vmem [shape: f32[24,8], index: 1, kind: input, shape index: {}]   ;;  %s389_s3 = inlined_call_operand.vmem [shape: f32[2,24,128], index: 3, kind: output, shape index: {}]  }
   0x1   :  { %276 = vmatprep.subr.mxu0 %v307_v0  ;;  %287 = vmatprep.subr.mxu1 %v307_v0  ;;  %v20_v1 = vld [vmem:[%s386_s0] sm:$0xff]  ;;  %v261_v2 = vld [vmem:[%s386_s0 + $0x8] sm:$0xff]  ;;  %v19_v7 = vld [vmem:[%s387_s2 + $0x10] sm:$0xff] }
   0x2   :  { %v21_v3 = vrot.slane %v20_v1, 4  ;;  %278 = vmatprep.mubr.msk.f32.mxu0 %vm308_vm0, %v307_v0  ;;  %v151_v4 = vrot.slane %v261_v2, 4  ;;  %289 = vmatprep.mubr.msk.f32.mxu1 %vm308_vm0, %v307_v0  ;;  %v17_v5 = vld [vmem:[%s387_s2] sm:$0xff]  ;;  %v18_v10 = vld [vmem:[%s387_s2 + $0x8] sm:$0xff]  ;;  %v16_v47 = vld [vmem:[%s388_s1 + $0x10] sm:$0xff] }
   0x3   :  { %301 = vset.pattern.permute.xlu0 %v309_v6  ;;  %302 = vset.pattern.permute.xlu1 %v309_v6  ;;  %v14_v44 = vld [vmem:[%s388_s1] sm:$0xff]  ;;  %v15_v46 = vld [vmem:[%s388_s1 + $0x8] sm:$0xff] }
   0x4   :  { %v22_v8 = vadd.f32 %v21_v3, %v20_v1  ;;  %v152_v9 = vadd.f32 %v261_v2, %v151_v4  ;;  %43 = vperm.xlu0 %301, %v17_v5   ;;  %53 = vperm.xlu1 %302, %v19_v7  }
   0x6   :  { %v23_v11 = vrot.slane %v22_v8, 2  ;;  %v153_v12 = vrot.slane %v152_v9, 2 }
   0x8   :  { %v24_v13 = vadd.f32 %v23_v11, %v22_v8  ;;  %v154_v14 = vadd.f32 %v153_v12, %v152_v9  ;;  %48 = vperm.xlu0 %301, %v18_v10  }
   0xa   :  { %v25_v15 = vrot.slane %v24_v13, 1  ;;  %v155_v16 = vrot.slane %v154_v14, 1 }
   0xc   :  { %v26_v17 = vadd.f32 %v25_v15, %v24_v13  ;;  %v156_v18 = vadd.f32 %v155_v16, %v154_v14 }
   0xe   :  { %v28_v19 = vmul.f32 0.125, %v26_v17  ;;  %v157_v20 = vmul.f32 0.125, %v156_v18 }
  0x10   :  { %v29_v21 = vsub.f32 %v20_v1, %v28_v19  ;;  %v158_v22 = vsub.f32 %v261_v2, %v157_v20 }
  0x12   :  { %v30_v23 = vmul.f32 %v29_v21, %v29_v21  ;;  %v159_v24 = vmul.f32 %v158_v22, %v158_v22 }
  0x14   :  { %v31_v25 = vrot.slane %v30_v23, 4  ;;  %v160_v26 = vrot.slane %v159_v24, 4 }
  0x16   :  { %v32_v27 = vadd.f32 %v31_v25, %v30_v23  ;;  %v161_v28 = vadd.f32 %v160_v26, %v159_v24 }
  0x18   :  { %v33_v29 = vrot.slane %v32_v27, 2  ;;  %v162_v30 = vrot.slane %v161_v28, 2 }
  0x1a   :  { %v34_v31 = vadd.f32 %v33_v29, %v32_v27  ;;  %v163_v32 = vadd.f32 %v162_v30, %v161_v28 }
  0x1c   :  { %v35_v33 = vrot.slane %v34_v31, 1  ;;  %v164_v34 = vrot.slane %v163_v32, 1 }
  0x1e   :  { %v36_v35 = vadd.f32 %v35_v33, %v34_v31  ;;  %v165_v36 = vadd.f32 %v164_v34, %v163_v32 }
  0x20   :  { %v37_v37 = vmul.f32 0.125, %v36_v35  ;;  %v166_v38 = vmul.f32 0.125, %v165_v36 }
  0x22   :  { %v38_v39 = vadd.f32 1e-05, %v37_v37  ;;  %v167_v40 = vadd.f32 1e-05, %v166_v38 }
  0x24   :  { %303 = vrsqrt.f32 %v38_v39 }
  0x25   :  { %305 = vrsqrt.f32 %v167_v40 }
  0x2e   :  { %v304_v41 = vpop.eup %303 }
  0x2f   :  { %v306_v42 = vpop.eup %305  ;;  %v40_v43 = vmul.f32 %v304_v41, %v29_v21 }
  0x30   :  { %v169_v45 = vmul.f32 %v306_v42, %v158_v22 }
  0x31   :  { %277 = vmatpush3.msra.mxu0 %v40_v43 }
  0x32   :  { %288 = vmatpush3.msra.mxu1 %v169_v45  ;;  %279 = vmatmul.mubr.msk.f32.vlgmr.msra.gmra.mrb[0].mxu0 %vm56_vm1, %v14_v44 }
  0x33   :  { %290 = vmatmul.mubr.msk.f32.vlgmr.msra.gmra.mrb[0].mxu1 %vm56_vm1, %v14_v44  ;;  %281 = vmatprep.mubr.msk.f32.mxu0 %vm308_vm0, %v307_v0 }
  0x34   :  { %292 = vmatprep.mubr.msk.f32.mxu1 %vm308_vm0, %v307_v0 }
  0x36   :  { %282 = vmatmul.mubr.msk.f32.gmra.mrb[2].mxu0 %vm56_vm1, %v15_v46 }
  0x37   :  { %293 = vmatmul.mubr.msk.f32.gmra.mrb[2].mxu1 %vm56_vm1, %v15_v46  ;;  %284 = vmatprep.mubr.msk.f32.mxu0 %vm308_vm0, %v307_v0 }
  0x38   :  { %295 = vmatprep.mubr.msk.f32.mxu1 %vm308_vm0, %v307_v0 }
  0x3a   :  { %285 = vmatmul.mubr.msk.f32.gmra.mrb[4].mxu0 %vm56_vm1, %v16_v47 }
  0x3b   :  { %296 = vmatmul.mubr.msk.f32.gmra.mrb[4].mxu1 %vm56_vm1, %v16_v47 }
  0x83   :  { %v44_v48 = vpop.permute.xlu0 %43  ;;  %v54_v62 = vpop.permute.xlu1 %53 }
  0x87   :  { %v49_v55 = vpop.permute.xlu0 %48 }
 0x105   :  { %v132_v49 = vpop.f32.mrb[0].mxu0 }
 0x106   :  { %v133_v50 = vadd.f32 %v132_v49, %v44_v48  ;;  %v236_v51 = vpop.f32.mrb[0].mxu1  ;;  %v280_v52 = vpop.f32.mrb[1].mxu0 }
 0x107   :  { %v237_v53 = vadd.f32 %v236_v51, %v44_v48  ;;  %v291_v54 = vpop.f32.mrb[1].mxu1 }
 0x108   :  { %146 = vst [vmem:[%s389_s3] sm:$0xff] %v133_v50 }
 0x109   :  { %265 = vst [vmem:[%s389_s3 + $0x18] sm:$0xff] %v237_v53  ;;  %v137_v56 = vpop.f32.mrb[2].mxu0 }
 0x10a   :  { %v138_v57 = vadd.f32 %v137_v56, %v49_v55  ;;  %v241_v58 = vpop.f32.mrb[2].mxu1  ;;  %v283_v59 = vpop.f32.mrb[3].mxu0 }
 0x10b   :  { %v242_v60 = vadd.f32 %v241_v58, %v49_v55  ;;  %v294_v61 = vpop.f32.mrb[3].mxu1 }
 0x10c   :  { %147 = vst [vmem:[%s389_s3 + $0x8] sm:$0xff] %v138_v57 }
 0x10d   :  { %266 = vst [vmem:[%s389_s3 + $0x20] sm:$0xff] %v242_v60  ;;  %v142_v63 = vpop.f32.mrb[4].mxu0 }
 0x10e   :  { %v143_v0 = vadd.f32 %v142_v63, %v54_v62  ;;  %v246_v1 = vpop.f32.mrb[4].mxu1  ;;  %v286_v2 = vpop.f32.mrb[5].mxu0 }
 0x10f   :  { %v247_v3 = vadd.f32 %v246_v1, %v54_v62  ;;  %v297_v4 = vpop.f32.mrb[5].mxu1 }
 0x110   :  { %148 = vst [vmem:[%s389_s3 + $0x10] sm:$0xff] %v143_v0 }
 0x111   :  { %267 = vst [vmem:[%s389_s3 + $0x28] sm:$0xff] %v247_v3 }

// kernel: _lambda_.13
= control target key start
LH: loop header
LB: loop body
LE: loop exit
PB: predicated region body
PF: predicated region fallthrough
CT: control target
= control target key end

     0   :  { %v206_v0 = vmov 0.0   ;;  %vm25_vm0 = vcmask 64512   ;;  %vm207_vm1 = vmmov 0   ;;  %v208_v5 = vmov 0   ;;  %s258_s0 = inlined_call_operand.vmem [shape: f32[2,8,128], index: 0, kind: input, shape index: {}]   ;;  %s259_s2 = inlined_call_operand.vmem [shape: f32[8,8], index: 2, kind: input, shape index: {}]   ;;  %s260_s3 = inlined_call_operand.vmem [shape: f32[8,1], index: 3, kind: input, shape index: {}]   ;;  %s261_s1 = inlined_call_operand.vmem [shape: f32[2,8,128], index: 1, kind: input, shape index: {}]   ;;  %s262_s4 = inlined_call_operand.vmem [shape: f32[2,8,128], index: 4, kind: output, shape index: {}]  }
   0x1   :  { %192 = vmatprep.subr.mxu0 %v206_v0  ;;  %197 = vmatprep.subr.mxu1 %v206_v0  ;;  %v19_v1 = vld [vmem:[%s258_s0] sm:$0xff]  ;;  %v184_v2 = vld [vmem:[%s258_s0 + $0x8] sm:$0xff] }
   0x2   :  { %v17_v3 = vld [vmem:[%s259_s2] sm:$0xff]  ;;  %193 = vmatpush3.msra.mxu0 %v19_v1  ;;  %194 = vmatprep.mubr.msk.f32.mxu0 %vm207_vm1, %v206_v0  ;;  %v186_v10 = vld [vmem:[%s261_s1 + $0x8] sm:$0xff] }
   0x3   :  { %198 = vmatpush3.msra.mxu1 %v184_v2  ;;  %199 = vmatprep.mubr.msk.f32.mxu1 %vm207_vm1, %v206_v0  ;;  %v18_v4 = vld [vmem:[%s260_s3] sm:$0xff] }
   0x4   :  { %195 = vmatmul.mubr.msk.f32.vlgmr.msra.gmra.mrb[0].mxu0 %vm25_vm0, %v17_v3  ;;  %200 = vmatmul.mubr.msk.f32.vlgmr.msra.gmra.mrb[0].mxu1 %vm25_vm0, %v17_v3  ;;  %v99_v8 = vld [vmem:[%s261_s1] sm:$0xff] }
   0x5   :  { %205 = vset.pattern.permute.xlu0 %v208_v5 }
   0x6   :  { %22 = vperm.xlu0 %205, %v18_v4  }
  0x85   :  { %v23_v6 = vpop.permute.xlu0 %22 }
  0xd7   :  { %v95_v7 = vpop.f32.mrb[0].mxu0  ;;  %v170_v9 = vpop.f32.mrb[0].mxu1 }
  0xd8   :  { %v96_v11 = vadd.f32 %v95_v7, %v23_v6  ;;  %v171_v12 = vadd.f32 %v170_v9, %v23_v6  ;;  %v196_v13 = vpop.f32.mrb[1].mxu0  ;;  %v201_v14 = vpop.f32.mrb[1].mxu1 }
  0xda   :  { %v100_v15 = vadd.f32 %v99_v8, %v96_v11  ;;  %v176_v16 = vadd.f32 %v186_v10, %v171_v12 }
  0xdc   :  { %101 = vst [vmem:[%s262_s4] sm:$0xff] %v100_v15  ;;  %187 = vst [vmem:[%s262_s4 + $0x8] sm:$0xff] %v176_v16 }

// kernel: _lambda_.15
= control target key start
LH: loop header
LB: loop body
LE: loop exit
PB: predicated region body
PF: predicated region fallthrough
CT: control target
= control target key end

     0   :  { %v250_v0 = vmov 0.0   ;;  %vm251_vm0 = vmmov 0   ;;  %v252_v6 = vmov 0   ;;  %vm45_vm1 = vcmask 64512   ;;  %s302_s0 = inlined_call_operand.vmem [shape: f32[2,8,128], index: 0, kind: input, shape index: {}]   ;;  %s303_s2 = inlined_call_operand.vmem [shape: f32[8,1], index: 2, kind: input, shape index: {}]   ;;  %s304_s1 = inlined_call_operand.vmem [shape: f32[8,8], index: 1, kind: input, shape index: {}]   ;;  %s305_s4 = inlined_call_operand.vmem [shape: f32[2,8,128], index: 4, kind: output, shape index: {1}]   ;;  %s306_s3 = inlined_call_operand.vmem [shape: f32[2,8,128], index: 3, kind: output, shape index: {0}]  }
   0x1   :  { %232 = vmatprep.subr.mxu0 %v250_v0  ;;  %237 = vmatprep.subr.mxu1 %v250_v0  ;;  %v18_v1 = vld [vmem:[%s302_s0] sm:$0xff]  ;;  %v224_v2 = vld [vmem:[%s302_s0 + $0x8] sm:$0xff] }
   0x2   :  { %v19_v3 = vrot.slane %v18_v1, 4  ;;  %234 = vmatprep.mubr.msk.f32.mxu0 %vm251_vm0, %v250_v0  ;;  %v122_v4 = vrot.slane %v224_v2, 4  ;;  %239 = vmatprep.mubr.msk.f32.mxu1 %vm251_vm0, %v250_v0  ;;  %v17_v5 = vld [vmem:[%s303_s2] sm:$0xff] }
   0x3   :  { %245 = vset.pattern.permute.xlu0 %v252_v6  ;;  %v16_v42 = vld [vmem:[%s304_s1] sm:$0xff] }
   0x4   :  { %v20_v7 = vadd.f32 %v19_v3, %v18_v1  ;;  %v123_v8 = vadd.f32 %v224_v2, %v122_v4  ;;  %42 = vperm.xlu0 %245, %v17_v5  }
   0x6   :  { %v21_v9 = vrot.slane %v20_v7, 2  ;;  %v124_v10 = vrot.slane %v123_v8, 2 }
   0x8   :  { %v22_v11 = vadd.f32 %v21_v9, %v20_v7  ;;  %v125_v12 = vadd.f32 %v124_v10, %v123_v8 }
   0xa   :  { %v23_v13 = vrot.slane %v22_v11, 1  ;;  %v126_v14 = vrot.slane %v125_v12, 1 }
   0xc   :  { %v24_v15 = vadd.f32 %v23_v13, %v22_v11  ;;  %v127_v16 = vadd.f32 %v126_v14, %v125_v12 }
   0xe   :  { %v26_v17 = vmul.f32 0.125, %v24_v15  ;;  %v128_v18 = vmul.f32 0.125, %v127_v16 }
  0x10   :  { %v27_v19 = vsub.f32 %v18_v1, %v26_v17  ;;  %v129_v20 = vsub.f32 %v224_v2, %v128_v18 }
  0x12   :  { %v28_v21 = vmul.f32 %v27_v19, %v27_v19  ;;  %v130_v22 = vmul.f32 %v129_v20, %v129_v20 }
  0x14   :  { %v29_v23 = vrot.slane %v28_v21, 4  ;;  %v131_v24 = vrot.slane %v130_v22, 4 }
  0x16   :  { %v30_v25 = vadd.f32 %v29_v23, %v28_v21  ;;  %v132_v26 = vadd.f32 %v131_v24, %v130_v22 }
  0x18   :  { %v31_v27 = vrot.slane %v30_v25, 2  ;;  %v133_v28 = vrot.slane %v132_v26, 2 }
  0x1a   :  { %v32_v29 = vadd.f32 %v31_v27, %v30_v25  ;;  %v134_v30 = vadd.f32 %v133_v28, %v132_v26 }
  0x1c   :  { %v33_v31 = vrot.slane %v32_v29, 1  ;;  %v135_v32 = vrot.slane %v134_v30, 1 }
  0x1e   :  { %v34_v33 = vadd.f32 %v33_v31, %v32_v29  ;;  %v136_v34 = vadd.f32 %v135_v32, %v134_v30 }
  0x20   :  { %v35_v35 = vmul.f32 0.125, %v34_v33  ;;  %v137_v36 = vmul.f32 0.125, %v136_v34 }
  0x22   :  { %v36_v37 = vadd.f32 1e-05, %v35_v35  ;;  %v138_v38 = vadd.f32 1e-05, %v137_v36 }
  0x24   :  { %246 = vrsqrt.f32 %v36_v37 }
  0x25   :  { %248 = vrsqrt.f32 %v138_v38 }
  0x2e   :  { %v247_v39 = vpop.eup %246 }
  0x2f   :  { %v249_v40 = vpop.eup %248  ;;  %v38_v41 = vmul.f32 %v247_v39, %v27_v19 }
  0x30   :  { %v140_v43 = vmul.f32 %v249_v40, %v129_v20 }
  0x31   :  { %39 = vst [vmem:[%s305_s4] sm:$0xff] %v38_v41  ;;  %233 = vmatpush3.msra.mxu0 %v38_v41 }
  0x32   :  { %225 = vst [vmem:[%s305_s4 + $0x8] sm:$0xff] %v140_v43  ;;  %238 = vmatpush3.msra.mxu1 %v140_v43  ;;  %235 = vmatmul.mubr.msk.f32.vlgmr.msra.gmra.mrb[0].mxu0 %vm45_vm1, %v16_v42 }
  0x33   :  { %240 = vmatmul.mubr.msk.f32.vlgmr.msra.gmra.mrb[0].mxu1 %vm45_vm1, %v16_v42 }
  0x83   :  { %v43_v44 = vpop.permute.xlu0 %42 }
 0x105   :  { %v115_v45 = vpop.f32.mrb[0].mxu0 }
 0x106   :  { %v116_v46 = vadd.f32 %v115_v45, %v43_v44  ;;  %v209_v47 = vpop.f32.mrb[0].mxu1  ;;  %v236_v48 = vpop.f32.mrb[1].mxu0 }
 0x107   :  { %v210_v49 = vadd.f32 %v209_v47, %v43_v44  ;;  %v241_v50 = vpop.f32.mrb[1].mxu1 }
 0x108   :  { %119 = vst [vmem:[%s306_s3] sm:$0xff] %v116_v46 }
 0x109   :  { %227 = vst [vmem:[%s306_s3 + $0x8] sm:$0xff] %v210_v49 }

// kernel: _lambda_.14
= control target key start
LH: loop header
LB: loop body
LE: loop exit
PB: predicated region body
PF: predicated region fallthrough
CT: control target
= control target key end

     0   :  { %vm57_vm0 = vcmask 64512   ;;  %v585_v3 = vmov 0   ;;  %v586_v45 = vmov 0.0|0.0   ;;  %vm587_vm1 = vmmov 0   ;;  %s703_s0 = inlined_call_operand.vmem [shape: f32[2,8,128], index: 0, kind: input, shape index: {}]   ;;  %s704_s1 = inlined_call_operand.vmem [shape: f32[16,8], index: 1, kind: input, shape index: {}]   ;;  %s705_s2 = inlined_call_operand.vmem [shape: f32[16,1], index: 2, kind: input, shape index: {}]   ;;  %s706_s4 = inlined_call_operand.vmem [shape: f32[8,1], index: 4, kind: input, shape index: {}]   ;;  %s707_s3 = inlined_call_operand.vmem [shape: f32[8,16], index: 3, kind: input, shape index: {}]   ;;  %s708_s5 = inlined_call_operand.vmem [shape: f32[2,8,128], index: 5, kind: output, shape index: {}]  }
   0x1   :  { %v622_v0 = vld [vmem:[%s703_s0] sm:$0xff]  ;;  %v627_v1 = vld [vmem:[%s703_s0 + $0x8] sm:$0xff]  ;;  %563 = vset.pattern.permute.xlu0 %v585_v3  ;;  %564 = vset.pattern.permute.xlu1 %v585_v3  ;;  %v588_v46 = vmov 0.0   ;;  %vm198_vm6 = vcmask 130048  }
   0x2   :  { %v20_v2 = vld [vmem:[%s704_s1] sm:$0xff]  ;;  %v27_v4 = vrot.slane %v622_v0, 4  ;;  %v276_v5 = vrot.slane %v627_v1, 4  ;;  %v24_v9 = vld [vmem:[%s705_s2 + $0x8] sm:$0xff]  ;;  %553 = vmatprep.subr.bf16.mxu1 %v586_v45  ;;  %538 = vmatprep.mubr.msk.f32.mxu1 %vm587_vm1, %v588_v46 }
   0x3   :  { %531 = vmatprep.mubr.msk.f32.mxu0 %vm57_vm0, %v20_v2  ;;  %v23_v6 = vld [vmem:[%s705_s2] sm:$0xff]  ;;  %v21_v43 = vld [vmem:[%s704_s1 + $0x8] sm:$0xff] }
   0x4   :  { %49 = vperm.xlu0 %563, %v23_v6   ;;  %v28_v7 = vadd.f32 %v27_v4, %v622_v0  ;;  %v277_v8 = vadd.f32 %v627_v1, %v276_v5  ;;  %v25_v47 = vld [vmem:[%s706_s4] sm:$0xff] }
   0x5   :  { %195 = vperm.xlu1 %564, %v25_v47  }
   0x6   :  { %v29_v10 = vrot.slane %v28_v7, 2  ;;  %v278_v11 = vrot.slane %v277_v8, 2 }
   0x8   :  { %54 = vperm.xlu0 %563, %v24_v9   ;;  %v30_v12 = vadd.f32 %v29_v10, %v28_v7  ;;  %v279_v13 = vadd.f32 %v278_v11, %v277_v8 }
   0xa   :  { %v31_v14 = vrot.slane %v30_v12, 1  ;;  %v280_v15 = vrot.slane %v279_v13, 1 }
   0xc   :  { %v32_v16 = vadd.f32 %v31_v14, %v30_v12  ;;  %v281_v17 = vadd.f32 %v280_v15, %v279_v13 }
   0xe   :  { %v34_v18 = vmul.f32 0.125, %v32_v16  ;;  %v282_v19 = vmul.f32 0.125, %v281_v17 }
  0x10   :  { %v35_v20 = vsub.f32 %v622_v0, %v34_v18  ;;  %v283_v21 = vsub.f32 %v627_v1, %v282_v19 }
  0x12   :  { %v36_v22 = vmul.f32 %v35_v20, %v35_v20  ;;  %v284_v23 = vmul.f32 %v283_v21, %v283_v21 }
  0x14   :  { %v37_v24 = vrot.slane %v36_v22, 4  ;;  %v285_v25 = vrot.slane %v284_v23, 4 }
  0x16   :  { %v38_v26 = vadd.f32 %v37_v24, %v36_v22  ;;  %v286_v27 = vadd.f32 %v285_v25, %v284_v23 }
  0x18   :  { %v39_v28 = vrot.slane %v38_v26, 2  ;;  %v287_v29 = vrot.slane %v286_v27, 2 }
  0x1a   :  { %v40_v30 = vadd.f32 %v39_v28, %v38_v26  ;;  %v288_v31 = vadd.f32 %v287_v29, %v286_v27 }
  0x1c   :  { %v41_v32 = vrot.slane %v40_v30, 1  ;;  %v289_v33 = vrot.slane %v288_v31, 1 }
  0x1e   :  { %v42_v34 = vadd.f32 %v41_v32, %v40_v30  ;;  %v290_v35 = vadd.f32 %v289_v33, %v288_v31 }
  0x20   :  { %v43_v36 = vmul.f32 0.125, %v42_v34  ;;  %v291_v37 = vmul.f32 0.125, %v290_v35 }
  0x22   :  { %v44_v38 = vadd.f32 1e-05, %v43_v36  ;;  %v292_v39 = vadd.f32 1e-05, %v291_v37 }
  0x24   :  { %565 = vrsqrt.f32 %v44_v38 }
  0x25   :  { %567 = vrsqrt.f32 %v292_v39 }
  0x2e   :  { %v566_v40 = vpop.eup %565 }
  0x2f   :  { %v568_v41 = vpop.eup %567  ;;  %v46_v42 = vmul.f32 %v566_v40, %v35_v20 }
  0x30   :  { %v294_v44 = vmul.f32 %v568_v41, %v283_v21 }
  0x31   :  { %529 = vmatprep.subr.mxu0 %v46_v42 }
  0x32   :  { %530 = vmatpush3.msra.mxu0 %v46_v42 }
  0x33   :  { %532 = vmatmul.mubr.msk.f32.vlgmr.msra.gmra.mrb[0].mxu0 %vm57_vm0, %v21_v43  ;;  %541 = vmatprep.subr.mxu0 %v294_v44 }
  0x34   :  { %542 = vmatpush3.msra.mxu0 %v294_v44  ;;  %543 = vmatprep.mubr.msk.f32.mxu0 %vm57_vm0, %v20_v2 }
  0x37   :  { %544 = vmatmul.mubr.msk.f32.vlgmr.msra.gmra.mrb[2].mxu0 %vm57_vm0, %v21_v43 }
  0x83   :  { %v50_v48 = vpop.permute.xlu0 %49 }
  0x87   :  { %v55_v49 = vpop.permute.xlu0 %54 }
 0x106   :  { %v533_v50 = vpop.f32.mrb[0].mxu0 }
 0x107   :  { %v657_v51 = vadd.f32 %v533_v50, %v55_v49  ;;  %v130_v52 = vpop.f32.mrb[1].mxu0 }
 0x108   :  { %v659_v53 = vadd.f32 %v130_v52, %v50_v48 }
 0x109   :  { %v662_v54 = vmul.f32 0.70710677, %v657_v51 }
 0x10a   :  { %v665_v55 = vmul.f32 0.70710677, %v659_v53  ;;  %v545_v56 = vpop.f32.mrb[2].mxu0 }
 0x10b   :  { %v144_v57 = vand.u32 2147483647, %v662_v54  ;;  %v668_v58 = vadd.f32 %v545_v56, %v55_v49  ;;  %v361_v59 = vpop.f32.mrb[3].mxu0  ;;  %vm184_vm2 = vcmp.lt.f32.partialorder %v662_v54, 0.0 }
 0x10c   :  { %v143_v60 = vand.u32 2147483647, %v665_v55  ;;  %v671_v61 = vadd.f32 %v361_v59, %v50_v48  ;;  %vm183_vm3 = vcmp.lt.f32.partialorder %v665_v55, 0.0 }
 0x10d   :  { %v146_v62 = vmul.f32 0.3275911, %v144_v57  ;;  %v674_v63 = vmul.f32 0.70710677, %v668_v58  ;;  %v172_v12 = vmul.f32 %v144_v57, %v144_v57  ;;  %v371_v55 = vmul.f32 0.5, %v668_v58  ;;  %v196_v58 = vpop.permute.xlu1 %195 }
 0x10e   :  { %v145_v2 = vmul.f32 0.3275911, %v143_v60  ;;  %v677_v3 = vmul.f32 0.70710677, %v671_v61  ;;  %v171_v13 = vmul.f32 %v143_v60, %v143_v60 }
 0x10f   :  { %v148_v4 = vadd.f32 1.0, %v146_v62  ;;  %v375_v5 = vand.u32 2147483647, %v674_v63  ;;  %v174_v15 = vsub.f32 0.0, %v172_v12  ;;  %vm415_vm4 = vcmp.lt.f32.partialorder %v674_v63, 0.0  ;;  %v22_v63 = vld [vmem:[%s707_s3] sm:$0xff] }
 0x110   :  { %v147_v6 = vadd.f32 1.0, %v145_v2  ;;  %v374_v7 = vand.u32 2147483647, %v677_v3  ;;  %v173_v18 = vsub.f32 0.0, %v171_v13  ;;  %vm414_vm5 = vcmp.lt.f32.partialorder %v677_v3, 0.0 }
 0x111   :  { %569 = vrcp.f32 %v148_v4  ;;  %v377_v8 = vmul.f32 0.3275911, %v375_v5  ;;  %v403_v16 = vmul.f32 %v375_v5, %v375_v5  ;;  %v177_v24 = vmul.f32 1.442695, %v174_v15 }
 0x112   :  { %571 = vrcp.f32 %v147_v6  ;;  %v376_v9 = vmul.f32 0.3275911, %v374_v7  ;;  %v402_v19 = vmul.f32 %v374_v7, %v374_v7  ;;  %v175_v28 = vmul.f32 1.442695, %v173_v18 }
 0x113   :  { %v379_v10 = vadd.f32 1.0, %v377_v8  ;;  %v405_v25 = vsub.f32 0.0, %v403_v16 }
 0x114   :  { %v378_v11 = vadd.f32 1.0, %v376_v9  ;;  %v404_v30 = vsub.f32 0.0, %v402_v19 }
 0x115   :  { %573 = vrcp.f32 %v379_v10  ;;  %v408_v36 = vmul.f32 1.442695, %v405_v25 }
 0x116   :  { %575 = vrcp.f32 %v378_v11  ;;  %v406_v40 = vmul.f32 1.442695, %v404_v30 }
 0x117   :  { %577 = vpow2.f32 %v177_v24 }
 0x118   :  { %579 = vpow2.f32 %v175_v28  ;;  %v140_v28 = vmul.f32 0.5, %v657_v51  ;;  %v370_v51 = vmul.f32 0.5, %v671_v61 }
 0x119   :  { %581 = vpow2.f32 %v408_v36 }
 0x11a   :  { %583 = vpow2.f32 %v406_v40 }
 0x11b   :  { %v570_v14 = vpop.eup %569 }
 0x11c   :  { %v572_v17 = vpop.eup %571  ;;  %v154_v20 = vmul.f32 1.0614054, %v570_v14 }
 0x11d   :  { %v153_v21 = vmul.f32 1.0614054, %v572_v17 }
 0x11e   :  { %v504_v22 = vadd.f32 -1.4531521, %v154_v20 }
 0x11f   :  { %v574_v23 = vpop.eup %573  ;;  %v503_v26 = vadd.f32 -1.4531521, %v153_v21 }
 0x120   :  { %v576_v27 = vpop.eup %575  ;;  %v385_v29 = vmul.f32 1.0614054, %v574_v23  ;;  %v158_v31 = vmul.f32 %v570_v14, %v504_v22 }
 0x121   :  { %v384_v32 = vmul.f32 1.0614054, %v576_v27  ;;  %v157_v33 = vmul.f32 %v572_v17, %v503_v26  ;;  %v578_v6 = vpop.eup %577 }
 0x122   :  { %v512_v34 = vadd.f32 -1.4531521, %v385_v29  ;;  %v160_v35 = vadd.f32 1.4214138, %v158_v31  ;;  %v580_v9 = vpop.eup %579  ;;  %v139_v31 = vmul.f32 0.5, %v659_v53 }
 0x123   :  { %v511_v37 = vadd.f32 -1.4531521, %v384_v32  ;;  %v159_v38 = vadd.f32 1.4214138, %v157_v33  ;;  %v582_v18 = vpop.eup %581 }
 0x124   :  { %v389_v39 = vmul.f32 %v574_v23, %v512_v34  ;;  %v162_v41 = vmul.f32 %v570_v14, %v160_v35  ;;  %v584_v21 = vpop.eup %583 }
 0x125   :  { %v388_v42 = vmul.f32 %v576_v27, %v511_v37  ;;  %v161_v43 = vmul.f32 %v572_v17, %v159_v38 }
 0x126   :  { %v391_v44 = vadd.f32 1.4214138, %v389_v39  ;;  %v506_v47 = vadd.f32 -0.28449672, %v162_v41 }
 0x127   :  { %v390_v48 = vadd.f32 1.4214138, %v388_v42  ;;  %v505_v49 = vadd.f32 -0.28449672, %v161_v43 }
 0x128   :  { %v393_v50 = vmul.f32 %v574_v23, %v391_v44  ;;  %v166_v52 = vmul.f32 %v570_v14, %v506_v47 }
 0x129   :  { %v392_v56 = vmul.f32 %v576_v27, %v390_v48  ;;  %v165_v57 = vmul.f32 %v572_v17, %v505_v49 }
 0x12a   :  { %v514_v59 = vadd.f32 -0.28449672, %v393_v50  ;;  %v168_v60 = vadd.f32 0.2548296, %v166_v52 }
 0x12b   :  { %v513_v62 = vadd.f32 -0.28449672, %v392_v56  ;;  %v167_v2 = vadd.f32 0.2548296, %v165_v57 }
 0x12c   :  { %v397_v4 = vmul.f32 %v574_v23, %v514_v59  ;;  %v170_v5 = vmul.f32 %v570_v14, %v168_v60 }
 0x12d   :  { %v396_v7 = vmul.f32 %v576_v27, %v513_v62  ;;  %v169_v8 = vmul.f32 %v572_v17, %v167_v2 }
 0x12e   :  { %v399_v10 = vadd.f32 0.2548296, %v397_v4  ;;  %v180_v11 = vmul.f32 %v578_v6, %v170_v5 }
 0x12f   :  { %v398_v12 = vadd.f32 0.2548296, %v396_v7  ;;  %v179_v13 = vmul.f32 %v580_v9, %v169_v8 }
 0x130   :  { %v401_v15 = vmul.f32 %v574_v23, %v399_v10  ;;  %v182_v16 = vsub.f32 1.0, %v180_v11 }
 0x131   :  { %v400_v19 = vmul.f32 %v576_v27, %v398_v12  ;;  %v181_v20 = vsub.f32 1.0, %v179_v13 }
 0x132   :  { %v411_v22 = vmul.f32 %v582_v18, %v401_v15  ;;  %v186_v24 = vsub.f32 0.0, %v182_v16 }
 0x133   :  { %v410_v25 = vmul.f32 %v584_v21, %v400_v19  ;;  %v185_v14 = vsub.f32 0.0, %v181_v20 }
 0x134   :  { %v413_v17 = vsub.f32 1.0, %v411_v22  ;;  %v188_v26 = vsel %vm184_vm2, %v186_v24, %v182_v16 }
 0x135   :  { %v412_v29 = vsub.f32 1.0, %v410_v25  ;;  %v187_v30 = vsel %vm183_vm3, %v185_v14, %v181_v20  ;;  %v190_v23 = vadd.f32 1.0, %v188_v26 }
 0x136   :  { %v417_v27 = vsub.f32 0.0, %v413_v17  ;;  %v189_v32 = vadd.f32 1.0, %v187_v30 }
 0x137   :  { %v416_v33 = vsub.f32 0.0, %v412_v29  ;;  %v192_v34 = vmul.f32 %v190_v23, %v140_v28 }
 0x138   :  { %v419_v54 = vsel %vm415_vm4, %v417_v27, %v413_v17  ;;  %v191_v35 = vmul.f32 %v189_v32, %v139_v31 }
 0x139   :  { %v421_v36 = vadd.f32 1.0, %v419_v54  ;;  %v418_v37 = vsel %vm414_vm5, %v416_v33, %v412_v29 }
 0x13a   :  { %v420_v38 = vadd.f32 1.0, %v418_v37  ;;  %v554_v39 = vpack.c.bf16 %v192_v34, %v191_v35 }
 0x13b   :  { %v423_v40 = vmul.f32 %v421_v36, %v371_v55 }
 0x13c   :  { %v422_v53 = vmul.f32 %v420_v38, %v370_v51  ;;  %555 = vmatpush3.bf16.msra.mxu1 %v554_v39 }
 0x13d   :  { %556 = vmatprep.subr.bf16.mxu1 %v586_v45 }
 0x13e   :  { %v557_v3 = vpack.c.bf16 %v423_v40, %v422_v53 }
 0x13f   :  { %539 = vmatmul.mubr.msk.f32.vlgmr.msra.gmra.mrb[0].mxu1 %vm198_vm6, %v22_v63 }
 0x140   :  { %558 = vmatpush3.bf16.msra.mxu1 %v557_v3  ;;  %550 = vmatprep.mubr.msk.f32.mxu1 %vm587_vm1, %v588_v46 }
 0x143   :  { %551 = vmatmul.mubr.msk.f32.vlgmr.msra.gmra.mrb[2].mxu1 %vm198_vm6, %v22_v63 }
 0x212   :  { %v268_v61 = vpop.f32.mrb[0].mxu1 }
 0x213   :  { %v269_v41 = vadd.f32 %v268_v61, %v196_v58  ;;  %v540_v42 = vpop.f32.mrb[1].mxu1 }
 0x215   :  { %v272_v43 = vadd.f32 %v269_v41, %v622_v0 }
 0x216   :  { %v490_v44 = vpop.f32.mrb[2].mxu1 }
 0x217   :  { %273 = vst [vmem:[%s708_s5] sm:$0xff] %v272_v43  ;;  %v491_v47 = vadd.f32 %v490_v44, %v196_v58  ;;  %v552_v45 = vpop.f32.mrb[3].mxu1 }
 0x219   :  { %v494_v48 = vadd.f32 %v627_v1, %v491_v47 }
 0x21b   :  { %516 = vst [vmem:[%s708_s5 + $0x8] sm:$0xff] %v494_v48 }

// kernel: _lambda_.23
= control target key start
LH: loop header
LB: loop body
LE: loop exit
PB: predicated region body
PF: predicated region fallthrough
CT: control target
= control target key end

     0   :  { %vm58_vm0 = vcmask 64512   ;;  %v624_v4 = vmov 0   ;;  %s751_s0 = inlined_call_operand.vmem [shape: f32[2,8,128], index: 0, kind: input, shape index: {}]   ;;  %s752_s1 = inlined_call_operand.vmem [shape: f32[16,8], index: 1, kind: input, shape index: {}]   ;;  %s753_s2 = inlined_call_operand.vmem [shape: f32[16,1], index: 2, kind: input, shape index: {}]   ;;  %s754_s3 = inlined_call_operand.vmem [shape: f32[8,16], index: 3, kind: input, shape index: {}]   ;;  %s755_s4 = inlined_call_operand.vmem [shape: f32[8,1], index: 4, kind: input, shape index: {}]   ;;  %s756_s5 = inlined_call_operand.hbm [shape: f32[2,8,128], index: 5, kind: output, shape index: {}]  }
   0x1   :  { %v664_v0 = vld [vmem:[%s751_s0] sm:$0xff]  ;;  %v674_v3 = vld [vmem:[%s751_s0 + $0x8] sm:$0xff]  ;;  %578 = vset.pattern.permute.xlu0 %v624_v4  ;;  %579 = vset.pattern.permute.xlu1 %v624_v4 }
   0x2   :  { %v21_v1 = vld [vmem:[%s752_s1] sm:$0xff]  ;;  %v28_v2 = vrot.slane %v664_v0, 4  ;;  %v277_v6 = vrot.slane %v674_v3, 4 }
   0x3   :  { %543 = vmatprep.mubr.msk.f32.mxu0 %vm58_vm0, %v21_v1  ;;  %v24_v5 = vld [vmem:[%s753_s2] sm:$0xff] }
   0x4   :  { %50 = vperm.xlu0 %578, %v24_v5  }
   0x5   :  { %10 = vsyncpa [#allocation3], 0  ;;  %v29_v7 = vadd.f32 %v28_v2, %v664_v0  ;;  %v25_v8 = vld [vmem:[%s753_s2 + $0x8] sm:$0xff]  ;;  %v278_v9 = vadd.f32 %v674_v3, %v277_v6  ;;  %v625_v45 = vmov 0.0|0.0   ;;  %vm626_vm1 = vmmov 0   ;;  %v26_v47 = vld [vmem:[%s755_s4] sm:$0xff] }
   0x6   :  { %v22_v43 = vld [vmem:[%s752_s1 + $0x8] sm:$0xff]  ;;  %565 = vmatprep.subr.bf16.mxu1 %v625_v45  ;;  %v627_v46 = vmov 0.0   ;;  %196 = vperm.xlu1 %579, %v26_v47   ;;  %vm199_vm6 = vcmask 130048   ;;  %s628_s30 = smov [#allocation2]  }
   0x7   :  { %v30_v10 = vrot.slane %v29_v7, 2  ;;  %v279_v11 = vrot.slane %v278_v9, 2  ;;  %550 = vmatprep.mubr.msk.f32.mxu1 %vm626_vm1, %v627_v46  ;;  %s503_s6 = sshll.u32 %s628_s30, 4  ;;  %s504_s6 = int_to_ptr.vmem [resolvable:$true] %s503_s6 }
   0x8   :  { %55 = vperm.xlu0 %578, %v25_v8   ;;  %p605_p1 = scmp.lt.s32.totalorder %s504_s6, %s504_s6 }
   0x9   :  { %v31_v12 = vadd.f32 %v30_v10, %v29_v7  ;;  %v280_v13 = vadd.f32 %v279_v11, %v278_v9 }
   0xb   :  { %v32_v14 = vrot.slane %v31_v12, 1  ;;  %v281_v15 = vrot.slane %v280_v13, 1 }
   0xd   :  { %v33_v16 = vadd.f32 %v32_v14, %v31_v12  ;;  %v282_v17 = vadd.f32 %v281_v15, %v280_v13 }
   0xf   :  { %v35_v18 = vmul.f32 0.125, %v33_v16  ;;  %v283_v19 = vmul.f32 0.125, %v282_v17 }
  0x11   :  { %v36_v20 = vsub.f32 %v664_v0, %v35_v18  ;;  %v284_v21 = vsub.f32 %v674_v3, %v283_v19 }
  0x13   :  { %v37_v22 = vmul.f32 %v36_v20, %v36_v20  ;;  %v285_v23 = vmul.f32 %v284_v21, %v284_v21 }
  0x15   :  { %v38_v24 = vrot.slane %v37_v22, 4  ;;  %v286_v25 = vrot.slane %v285_v23, 4 }
  0x17   :  { %v39_v26 = vadd.f32 %v38_v24, %v37_v22  ;;  %v287_v27 = vadd.f32 %v286_v25, %v285_v23 }
  0x19   :  { %v40_v28 = vrot.slane %v39_v26, 2  ;;  %v288_v29 = vrot.slane %v287_v27, 2 }
  0x1b   :  { %v41_v30 = vadd.f32 %v40_v28, %v39_v26  ;;  %v289_v31 = vadd.f32 %v288_v29, %v287_v27 }
  0x1d   :  { %v42_v32 = vrot.slane %v41_v30, 1  ;;  %v290_v33 = vrot.slane %v289_v31, 1 }
  0x1f   :  { %v43_v34 = vadd.f32 %v42_v32, %v41_v30  ;;  %v291_v35 = vadd.f32 %v290_v33, %v289_v31 }
  0x21   :  { %v44_v36 = vmul.f32 0.125, %v43_v34  ;;  %v292_v37 = vmul.f32 0.125, %v291_v35 }
  0x23   :  { %v45_v38 = vadd.f32 1e-05, %v44_v36  ;;  %v293_v39 = vadd.f32 1e-05, %v292_v37 }
  0x25   :  { %580 = vrsqrt.f32 %v45_v38 }
  0x26   :  { %582 = vrsqrt.f32 %v293_v39 }
  0x2f   :  { %v581_v40 = vpop.eup %580 }
  0x30   :  { %v583_v41 = vpop.eup %582  ;;  %v47_v42 = vmul.f32 %v581_v40, %v36_v20 }
  0x31   :  { %v295_v44 = vmul.f32 %v583_v41, %v284_v21 }
  0x32   :  { %541 = vmatprep.subr.mxu0 %v47_v42 }
  0x33   :  { %542 = vmatpush3.msra.mxu0 %v47_v42 }
  0x34   :  { %544 = vmatmul.mubr.msk.f32.vlgmr.msra.gmra.mrb[0].mxu0 %vm58_vm0, %v22_v43  ;;  %553 = vmatprep.subr.mxu0 %v295_v44 }
  0x35   :  { %554 = vmatpush3.msra.mxu0 %v295_v44  ;;  %555 = vmatprep.mubr.msk.f32.mxu0 %vm58_vm0, %v21_v1 }
  0x38   :  { %556 = vmatmul.mubr.msk.f32.vlgmr.msra.gmra.mrb[2].mxu0 %vm58_vm0, %v22_v43 }
  0x83   :  { %v51_v48 = vpop.permute.xlu0 %50 }
  0x87   :  { %v56_v49 = vpop.permute.xlu0 %55 }
 0x107   :  { %v545_v50 = vpop.f32.mrb[0].mxu0 }
 0x108   :  { %v699_v51 = vadd.f32 %v545_v50, %v56_v49  ;;  %v131_v52 = vpop.f32.mrb[1].mxu0 }
 0x109   :  { %v701_v53 = vadd.f32 %v131_v52, %v51_v48 }
 0x10a   :  { %v704_v54 = vmul.f32 0.70710677, %v699_v51 }
 0x10b   :  { %v707_v55 = vmul.f32 0.70710677, %v701_v53  ;;  %v557_v56 = vpop.f32.mrb[2].mxu0 }
 0x10c   :  { %v145_v57 = vand.u32 2147483647, %v704_v54  ;;  %v710_v58 = vadd.f32 %v557_v56, %v56_v49  ;;  %v362_v59 = vpop.f32.mrb[3].mxu0  ;;  %vm185_vm2 = vcmp.lt.f32.partialorder %v704_v54, 0.0 }
 0x10d   :  { %v144_v60 = vand.u32 2147483647, %v707_v55  ;;  %v713_v61 = vadd.f32 %v362_v59, %v51_v48  ;;  %vm184_vm3 = vcmp.lt.f32.partialorder %v707_v55, 0.0 }
 0x10e   :  { %v147_v62 = vmul.f32 0.3275911, %v145_v57  ;;  %v716_v63 = vmul.f32 0.70710677, %v710_v58  ;;  %v173_v12 = vmul.f32 %v145_v57, %v145_v57  ;;  %v372_v55 = vmul.f32 0.5, %v710_v58  ;;  %v197_v58 = vpop.permute.xlu1 %196 }
 0x10f   :  { %v146_v1 = vmul.f32 0.3275911, %v144_v60  ;;  %v719_v2 = vmul.f32 0.70710677, %v713_v61  ;;  %v172_v13 = vmul.f32 %v144_v60, %v144_v60 }
 0x110   :  { %v149_v4 = vadd.f32 1.0, %v147_v62  ;;  %v376_v5 = vand.u32 2147483647, %v716_v63  ;;  %v175_v15 = vsub.f32 0.0, %v173_v12  ;;  %vm416_vm4 = vcmp.lt.f32.partialorder %v716_v63, 0.0  ;;  %v23_v63 = vld [vmem:[%s754_s3] sm:$0xff] }
 0x111   :  { %v148_v6 = vadd.f32 1.0, %v146_v1  ;;  %v375_v7 = vand.u32 2147483647, %v719_v2  ;;  %v174_v18 = vsub.f32 0.0, %v172_v13  ;;  %vm415_vm5 = vcmp.lt.f32.partialorder %v719_v2, 0.0  ;;  %s600_s3 = scalar_lea.vmem %s504_s6, 256 }
 0x112   :  { %584 = vrcp.f32 %v149_v4  ;;  %v378_v8 = vmul.f32 0.3275911, %v376_v5  ;;  %v404_v16 = vmul.f32 %v376_v5, %v376_v5  ;;  %v178_v24 = vmul.f32 1.442695, %v175_v15  ;;  %p601_p0 = scmp.ne.s32.totalorder %s504_s6, %s600_s3  ;;  %p606_p2 = scmp.lt.s32.totalorder %s600_s3, %s600_s3 }
 0x113   :  { %586 = vrcp.f32 %v148_v6  ;;  %v377_v9 = vmul.f32 0.3275911, %v375_v7  ;;  %v403_v19 = vmul.f32 %v375_v7, %v375_v7  ;;  %v176_v28 = vmul.f32 1.442695, %v174_v18 }
 0x114   :  { %v380_v10 = vadd.f32 1.0, %v378_v8  ;;  %v406_v25 = vsub.f32 0.0, %v404_v16  ;;  %p607_p3 = por %p606_p2, %p605_p1 }
 0x115   :  { %v379_v11 = vadd.f32 1.0, %v377_v9  ;;  %v405_v30 = vsub.f32 0.0, %v403_v19 }
 0x116   :  { %588 = vrcp.f32 %v380_v10  ;;  %v409_v36 = vmul.f32 1.442695, %v406_v25  ;;  %p608_p4 = pnand %p607_p3, %p601_p0 }
 0x117   :  { %590 = vrcp.f32 %v379_v11  ;;  %v407_v40 = vmul.f32 1.442695, %v405_v30 }
 0x118   :  { %592 = vpow2.f32 %v178_v24 }
 0x119   :  { %594 = vpow2.f32 %v176_v28  ;;  %v141_v28 = vmul.f32 0.5, %v699_v51  ;;  %v371_v51 = vmul.f32 0.5, %v713_v61 }
 0x11a   :  { %596 = vpow2.f32 %v409_v36 }
 0x11b   :  { %598 = vpow2.f32 %v407_v40 }
 0x11c   :  { %v585_v14 = vpop.eup %584 }
 0x11d   :  { %v587_v17 = vpop.eup %586  ;;  %v155_v20 = vmul.f32 1.0614054, %v585_v14 }
 0x11e   :  { %v154_v21 = vmul.f32 1.0614054, %v587_v17 }
 0x11f   :  { %v517_v22 = vadd.f32 -1.4531521, %v155_v20 }
 0x120   :  { %v589_v23 = vpop.eup %588  ;;  %v516_v26 = vadd.f32 -1.4531521, %v154_v21 }
 0x121   :  { %v591_v27 = vpop.eup %590  ;;  %v386_v29 = vmul.f32 1.0614054, %v589_v23  ;;  %v159_v31 = vmul.f32 %v585_v14, %v517_v22 }
 0x122   :  { %v385_v32 = vmul.f32 1.0614054, %v591_v27  ;;  %v158_v33 = vmul.f32 %v587_v17, %v516_v26  ;;  %v593_v6 = vpop.eup %592 }
 0x123   :  { %v525_v34 = vadd.f32 -1.4531521, %v386_v29  ;;  %v161_v35 = vadd.f32 1.4214138, %v159_v31  ;;  %v595_v9 = vpop.eup %594  ;;  %v140_v31 = vmul.f32 0.5, %v701_v53 }
 0x124   :  { %v524_v37 = vadd.f32 -1.4531521, %v385_v32  ;;  %v160_v38 = vadd.f32 1.4214138, %v158_v33  ;;  %v597_v18 = vpop.eup %596 }
 0x125   :  { %v390_v39 = vmul.f32 %v589_v23, %v525_v34  ;;  %v163_v41 = vmul.f32 %v585_v14, %v161_v35  ;;  %v599_v21 = vpop.eup %598 }
 0x126   :  { %v389_v42 = vmul.f32 %v591_v27, %v524_v37  ;;  %v162_v43 = vmul.f32 %v587_v17, %v160_v38 }
 0x127   :  { %v392_v44 = vadd.f32 1.4214138, %v390_v39  ;;  %v519_v47 = vadd.f32 -0.28449672, %v163_v41 }
 0x128   :  { %v391_v48 = vadd.f32 1.4214138, %v389_v42  ;;  %v518_v49 = vadd.f32 -0.28449672, %v162_v43 }
 0x129   :  { %v394_v50 = vmul.f32 %v589_v23, %v392_v44  ;;  %v167_v52 = vmul.f32 %v585_v14, %v519_v47 }
 0x12a   :  { %v393_v56 = vmul.f32 %v591_v27, %v391_v48  ;;  %v166_v57 = vmul.f32 %v587_v17, %v518_v49 }
 0x12b   :  { %v527_v59 = vadd.f32 -0.28449672, %v394_v50  ;;  %v169_v60 = vadd.f32 0.2548296, %v167_v52 }
 0x12c   :  { %v526_v62 = vadd.f32 -0.28449672, %v393_v56  ;;  %v168_v1 = vadd.f32 0.2548296, %v166_v57 }
 0x12d   :  { %v398_v4 = vmul.f32 %v589_v23, %v527_v59  ;;  %v171_v5 = vmul.f32 %v585_v14, %v169_v60 }
 0x12e   :  { %v397_v7 = vmul.f32 %v591_v27, %v526_v62  ;;  %v170_v8 = vmul.f32 %v587_v17, %v168_v1 }
 0x12f   :  { %v400_v10 = vadd.f32 0.2548296, %v398_v4  ;;  %v181_v11 = vmul.f32 %v593_v6, %v171_v5 }
 0x130   :  { %v399_v12 = vadd.f32 0.2548296, %v397_v7  ;;  %v180_v13 = vmul.f32 %v595_v9, %v170_v8 }
 0x131   :  { %v402_v15 = vmul.f32 %v589_v23, %v400_v10  ;;  %v183_v16 = vsub.f32 1.0, %v181_v11 }
 0x132   :  { %v401_v19 = vmul.f32 %v591_v27, %v399_v12  ;;  %v182_v20 = vsub.f32 1.0, %v180_v13 }
 0x133   :  { %v412_v22 = vmul.f32 %v597_v18, %v402_v15  ;;  %v187_v24 = vsub.f32 0.0, %v183_v16 }
 0x134   :  { %v411_v25 = vmul.f32 %v599_v21, %v401_v19  ;;  %v186_v14 = vsub.f32 0.0, %v182_v20 }
 0x135   :  { %v414_v17 = vsub.f32 1.0, %v412_v22  ;;  %v189_v26 = vsel %vm185_vm2, %v187_v24, %v183_v16 }
 0x136   :  { %v413_v29 = vsub.f32 1.0, %v411_v25  ;;  %v188_v30 = vsel %vm184_vm3, %v186_v14, %v182_v20  ;;  %v191_v23 = vadd.f32 1.0, %v189_v26 }
 0x137   :  { %v418_v27 = vsub.f32 0.0, %v414_v17  ;;  %v190_v32 = vadd.f32 1.0, %v188_v30 }
 0x138   :  { %v417_v33 = vsub.f32 0.0, %v413_v29  ;;  %v193_v34 = vmul.f32 %v191_v23, %v141_v28 }
 0x139   :  { %v420_v54 = vsel %vm416_vm4, %v418_v27, %v414_v17  ;;  %v192_v35 = vmul.f32 %v190_v32, %v140_v31 }
 0x13a   :  { %v422_v36 = vadd.f32 1.0, %v420_v54  ;;  %v419_v37 = vsel %vm415_vm5, %v417_v33, %v413_v29 }
 0x13b   :  { %v421_v38 = vadd.f32 1.0, %v419_v37  ;;  %v566_v39 = vpack.c.bf16 %v193_v34, %v192_v35 }
 0x13c   :  { %v424_v40 = vmul.f32 %v422_v36, %v372_v55 }
 0x13d   :  { %v423_v53 = vmul.f32 %v421_v38, %v371_v51  ;;  %567 = vmatpush3.bf16.msra.mxu1 %v566_v39 }
 0x13e   :  { %568 = vmatprep.subr.bf16.mxu1 %v625_v45 }
 0x13f   :  { %v569_v2 = vpack.c.bf16 %v424_v40, %v423_v53 }
 0x140   :  { %551 = vmatmul.mubr.msk.f32.vlgmr.msra.gmra.mrb[0].mxu1 %vm199_vm6, %v23_v63 }
 0x141   :  { %570 = vmatpush3.bf16.msra.mxu1 %v569_v2  ;;  %562 = vmatprep.mubr.msk.f32.mxu1 %vm626_vm1, %v627_v46 }
 0x144   :  { %563 = vmatmul.mubr.msk.f32.vlgmr.msra.gmra.mrb[2].mxu1 %vm199_vm6, %v23_v63 }
 0x213   :  { %v269_v61 = vpop.f32.mrb[0].mxu1 }
 0x214   :  { %v270_v41 = vadd.f32 %v269_v61, %v197_v58  ;;  %v552_v42 = vpop.f32.mrb[1].mxu1 }
 0x216   :  { %v273_v43 = vadd.f32 %v270_v41, %v664_v0 }
 0x217   :  { %v491_v44 = vpop.f32.mrb[2].mxu1 }
 0x218   :  { %274 = vst [vmem:[#allocation2] sm:$0xff] %v273_v43  ;;  %v492_v47 = vadd.f32 %v491_v44, %v197_v58  ;;  %v564_v48 = vpop.f32.mrb[3].mxu1 }
 0x21a   :  { %v495_v45 = vadd.f32 %v674_v3, %v492_v47 }
 0x21c   :  { %497 = vst [vmem:[#allocation2 + $0x8] sm:$0xff] %v495_v45 }
 0x21d   :  { %611 = shalt.err (!%p608_p4)
}
 0x21e   :  { %s612_s9 = scalar_lea.hbm %s756_s5, 256 }
 0x21f   :  { %p613_p5 = scmp.ne.s32.totalorder %s756_s5, %s612_s9  ;;  %p616_p6 = scmp.lt.u32.totalorder %s612_s9, %s756_s5 }
 0x221   :  { %p618_p7 = pnand %p616_p6, %p613_p5 }
 0x223   :  { %621 = shalt.err (!%p618_p7)
}
 0x224   :  { %s629_s14 = smov 128   ;;  %s630_s15 = smov 8  }
 0x225   :  { %509 = dma.vmem_to_hbm [thread:$0]  %s504_s6, 256, %s756_s5, [#allocation3], %s629_s14, %s629_s14, %s630_s15  }
 0x226   :  { %622 = dma.done.wait [#allocation3], 256  }
 0x227   :  { %623 = vsyncadd [#allocation3], 4294967040 }
 0x228   :  { %513 = vsyncpa [#allocation3], 1 }

</bundles_post_ra>
